<compile_context>
chip_gen: v5e
topology: v5e:2x2
jax: 0.10.0
libtpu: 0.0.40
codegen_flags: <defaults>
</compile_context>

<pallas_src>
import functools

import jax
import jax.numpy as jnp
from jax import lax
from jax.experimental import pallas as pl
from jax.experimental.pallas import tpu as pltpu


def conv_bn_relu6_kernel(x_ref, w_ref, shift_ref, o_ref, *, stride, tile_h):
    """One (batch, cout-tile, row-tile) grid step.

    x_ref:     (1, Hp, Wp, Cin_p)       zero-padded NHWC input (bf16), full image
    w_ref:     (9, Cin_p, t_cout)       BN-scale-folded weights (bf16), tap-major
    shift_ref: (1, t_cout)              folded BN shift = beta - mean*scale (f32)
    o_ref:     (1, tile_h, Wo, t_cout)  output tile
    """
    _, _, wo, t_cout = o_ref.shape
    cin_p = x_ref.shape[-1]
    m = tile_h * wo
    win_h = (tile_h - 1) * stride + 3

    r = pl.program_id(2)  # row-tile index (innermost grid axis)
    row0 = pl.multiple_of(r * (tile_h * stride), tile_h * stride)

    # Row window covering this output row tile plus the 3x3 halo.
    xt = x_ref[0, pl.ds(row0, win_h), :, :]          # (win_h, Wp, Cin_p)

    # Tap-accumulate: 9 MXU dots with K = Cin_p and f32 accumulation. No im2col
    # patch is materialized (no extra vst/vld round trip, no lane concat).
    acc = jnp.zeros((m, t_cout), jnp.float32)
    for kh in range(3):
        for kw in range(3):
            slab = lax.slice(
                xt,
                (kh, kw, 0),
                (kh + stride * (tile_h - 1) + 1,
                 kw + stride * (wo - 1) + 1,
                 cin_p),
                (stride, stride, 1))                 # (tile_h, wo, cin_p)
            acc = acc + jnp.dot(slab.reshape(m, cin_p), w_ref[kh * 3 + kw],
                                preferred_element_type=jnp.float32)

    # BN shift + ReLU6 clip, then store.
    y = jnp.clip(acc + shift_ref[0], 0.0, 6.0)
    o_ref[0] = y.reshape(tile_h, wo, t_cout).astype(o_ref.dtype)


def _round_up(x, m):
    return ((x + m - 1) // m) * m


def _pick_row_tile(ho, wo, target_m=512):
    """Largest divisor of ho with tile_h * wo <= target_m (MXU M near 256-512)."""
    best = 1
    for t in range(1, ho + 1):
        if ho % t == 0 and t * wo <= target_m:
            best = t
    return best


def _pick_cout_tile(cout):
    if cout % 256 == 0:
        return 256          # fills the 256-wide MXU N on v6e/v7x
    if cout % 128 == 0:
        return 128          # lane-dense, matches v5e's 128-wide MXU
    # Non-128-multiple / small Cout: one exact-width tile so we never allocate
    # or write padded output channels (biggest writeback win for tiny Cout).
    return _round_up(cout, 8)


def _vmem_cap_bytes():
    try:
        return int(pltpu.get_tpu_info().vmem_capacity_bytes)
    except Exception:
        return 64 * 1024 * 1024   # conservative: v7x per-TensorCore VMEM


def conv_bn_relu6(x_nchw, weight_oihw, gamma, beta, running_mean, running_var,
                  *, stride=1, eps=1e-5):
    n, cin, h, w = x_nchw.shape
    cout = weight_oihw.shape[0]
    ho = (h + 2 - 3) // stride + 1
    wo = (w + 2 - 3) // stride + 1
    hp, wp = h + 2, w + 2

    # Channel padding / tiling.  With tap-accumulate there is no lane concat,
    # so a sublane (8) multiple suffices for small Cin; keep 128-multiples when
    # Cin is already large so each dot's K stays lane-aligned.
    cin_p = _round_up(cin, 128) if cin >= 128 else _round_up(cin, 8)
    t_cout = _pick_cout_tile(cout)
    cout_p = _round_up(cout, t_cout)
    n_cout = cout_p // t_cout

    # Row tiling: target an MXU M (= tile_h * wo) near 512.
    tile_h = _pick_row_tile(ho, wo)
    n_rows = ho // tile_h

    # NCHW -> NHWC, pad spatial by 1 (Conv2d padding=1), pad Cin; bf16 for MXU.
    x = jnp.transpose(x_nchw, (0, 2, 3, 1))
    xp = jnp.pad(x, ((0, 0), (1, 1), (1, 1), (0, cin_p - cin))).astype(jnp.bfloat16)

    # Fold BatchNorm (inference) into the conv weights: scale -> weights, shift kept.
    scale = gamma / jnp.sqrt(running_var + eps)                   # (cout,)
    shift = beta - running_mean * scale                           # (cout,)
    w_hwio = jnp.transpose(weight_oihw, (2, 3, 1, 0)) * scale     # (3,3,cin,cout)
    w_hwio = jnp.pad(w_hwio, ((0, 0), (0, 0), (0, cin_p - cin), (0, cout_p - cout)))
    w3d = w_hwio.reshape(9, cin_p, cout_p).astype(jnp.bfloat16)   # tap-major rows
    shift_p = jnp.pad(shift, (0, cout_p - cout)).reshape(1, cout_p).astype(jnp.float32)

    out_dtype = x_nchw.dtype
    out_itemsize = jnp.dtype(out_dtype).itemsize

    # Explicit VMEM budget: double-buffered blocks + in-kernel temporaries,
    # clamped to 75% of per-core VMEM so the compiler keeps scratch headroom.
    m = tile_h * wo
    blk_bytes = (hp * wp * cin_p * 2                        # input image (bf16)
                 + 9 * cin_p * t_cout * 2                   # weight tile (bf16)
                 + t_cout * 4                               # shift tile (f32)
                 + tile_h * wo * t_cout * out_itemsize)     # output tile
    tmp_bytes = m * cin_p * 2 + m * t_cout * 4              # tap slab + f32 acc
    vmem_limit = int(min(max(2 * blk_bytes + 2 * tmp_bytes + (8 << 20), 16 << 20),
                         int(0.75 * _vmem_cap_bytes())))

    kernel = functools.partial(conv_bn_relu6_kernel, stride=stride, tile_h=tile_h)
    out_nhwc = pl.pallas_call(
        kernel,
        out_shape=jax.ShapeDtypeStruct((n, ho, wo, cout_p), out_dtype),
        grid_spec=pltpu.PrefetchScalarGridSpec(
            num_scalar_prefetch=0,
            # Row axis innermost: weight/shift block indices only change with
            # the cout axis, so they stay VMEM-resident across the row loop.
            grid=(n, n_cout, n_rows),
            in_specs=[
                # Full padded image per batch element (resident across (c, r)).
                pl.BlockSpec((1, hp, wp, cin_p), lambda b, c, r: (b, 0, 0, 0)),
                pl.BlockSpec((9, cin_p, t_cout), lambda b, c, r: (0, 0, c)),
                pl.BlockSpec((1, t_cout), lambda b, c, r: (0, c)),
            ],
            out_specs=pl.BlockSpec((1, tile_h, wo, t_cout),
                                   lambda b, c, r: (b, r, 0, c)),
        ),
        compiler_params=pltpu.CompilerParams(
            dimension_semantics=("parallel", "parallel", "parallel"),
            vmem_limit_bytes=vmem_limit),
    )(xp, w3d, shift_p)

    # Drop any Cout padding (no-op when cout == cout_p), NHWC -> NCHW for
    # PyTorch output parity.
    return jnp.transpose(out_nhwc[..., :cout], (0, 3, 1, 2))


def _reference(x_nchw, weight_oihw, gamma, beta, running_mean, running_var,
               *, stride=1, eps=1e-5):
    """Pure-XLA f32 reference (same eval-mode semantics)."""
    x = jnp.transpose(x_nchw, (0, 2, 3, 1))
    w_hwio = jnp.transpose(weight_oihw, (2, 3, 1, 0))
    y = lax.conv_general_dilated(
        x, w_hwio, window_strides=(stride, stride),
        padding=((1, 1), (1, 1)),
        dimension_numbers=("NHWC", "HWIO", "NHWC"))
    scale = gamma / jnp.sqrt(running_var + eps)
    shift = beta - running_mean * scale
    y = jnp.clip(y * scale + shift, 0.0, 6.0)
    return jnp.transpose(y, (0, 3, 1, 2))


if __name__ == "__main__":
    key = jax.random.PRNGKey(0)
    k1, k2, k3, k4, k5, k6 = jax.random.split(key, 6)

    N, Cin, H, W = 2, 4, 16, 16
    Cout, stride = 8, 1

    x = jax.random.normal(k1, (N, Cin, H, W), dtype=jnp.float32)
    weight = 0.1 * jax.random.normal(k2, (Cout, Cin, 3, 3), dtype=jnp.float32)
    gamma = 1.0 + 0.1 * jax.random.normal(k3, (Cout,), dtype=jnp.float32)
    beta = 0.1 * jax.random.normal(k4, (Cout,), dtype=jnp.float32)
    running_mean = 0.1 * jax.random.normal(k5, (Cout,), dtype=jnp.float32)
    running_var = 1.0 + jnp.abs(jax.random.normal(k6, (Cout,), dtype=jnp.float32))

    out = conv_bn_relu6(x, weight, gamma, beta, running_mean, running_var,
                        stride=stride)
    out = jax.block_until_ready(out)

    ref = _reference(x, weight, gamma, beta, running_mean, running_var,
                     stride=stride)
    assert out.shape == (N, Cout, H // stride, W // stride), out.shape
    # bf16 MXU inputs (f32 accumulation) vs pure-f32 reference -> loose tol.
    assert jnp.allclose(out, ref, atol=3e-2, rtol=3e-2), "mismatch vs reference"

    print("KERNEL_OK")
</pallas_src>

<mosaic_0001>
module attributes {stable_mosaic.version = 11 : i64} {
  func.func @conv_bn_relu6_kernel(%arg0: i32, %arg1: i32, %arg2: i32, %arg3: memref<1x18x18x8xbf16, #tpu.memory_space<vmem>>, %arg4: memref<9x8x8xbf16, #tpu.memory_space<vmem>>, %arg5: memref<1x8xf32, #tpu.memory_space<vmem>>, %arg6: memref<1x16x16x8xf32, #tpu.memory_space<vmem>>) attributes {dimension_semantics = [#tpu.dimension_semantics<parallel>, #tpu.dimension_semantics<parallel>, #tpu.dimension_semantics<parallel>], iteration_bounds = array<i64: 2, 1, 1>, scalar_prefetch = 0 : i64, scratch_operands = 0 : i64, tpu.core_type = #tpu.core_type<tc>, window_params = [{transform_indices = @transform_0, window_bounds = array<i64: 1, 18, 18, 8>}, {transform_indices = @transform_1, window_bounds = array<i64: 9, 8, 8>}, {transform_indices = @transform_2, window_bounds = array<i64: 1, 8>}, {transform_indices = @transform_3, window_bounds = array<i64: 1, 16, 16, 8>}]} {
    %c16_i32 = arith.constant 16 : i32
    %0 = arith.muli %arg2, %c16_i32 : i32
    %1 = tpu.assume_multiple %0, 16 : i32
    %c0 = arith.constant 0 : index
    %2 = arith.index_cast %1 : i32 to index
    %c0_0 = arith.constant 0 : index
    %c0_1 = arith.constant 0 : index
    %3 = vector.load %arg3[%c0, %2, %c0_0, %c0_1] : memref<1x18x18x8xbf16, #tpu.memory_space<vmem>>, vector<1x18x18x8xbf16>
    %4 = vector.shape_cast %3 : vector<1x18x18x8xbf16> to vector<18x18x8xbf16>
    %cst = arith.constant 0.000000e+00 : f32
    %5 = vector.broadcast %cst : f32 to vector<256x8xf32>
    %6 = vector.extract_strided_slice %4 {offsets = [0, 0, 0], sizes = [16, 16, 8], strides = [1, 1, 1]} : vector<18x18x8xbf16> to vector<16x16x8xbf16>
    %7 = vector.shape_cast %6 : vector<16x16x8xbf16> to vector<256x8xbf16>
    %c0_2 = arith.constant 0 : index
    %c0_3 = arith.constant 0 : index
    %c0_4 = arith.constant 0 : index
    %8 = vector.load %arg4[%c0_2, %c0_3, %c0_4] : memref<9x8x8xbf16, #tpu.memory_space<vmem>>, vector<1x8x8xbf16>
    %9 = vector.shape_cast %8 : vector<1x8x8xbf16> to vector<8x8xbf16>
    %cst_5 = arith.constant dense<0.000000e+00> : vector<256x8xf32>
    %10 = tpu.matmul %7, %9, %cst_5 {dimension_numbers = #tpu.dot_dimension_numbers<[1], [0], [0], [1], [0, 0, 1, 1], [], []>} : vector<256x8xbf16>, vector<8x8xbf16>, vector<256x8xf32> -> vector<256x8xf32>
    %11 = arith.addf %5, %10 : vector<256x8xf32>
    %12 = vector.extract_strided_slice %4 {offsets = [0, 1, 0], sizes = [16, 16, 8], strides = [1, 1, 1]} : vector<18x18x8xbf16> to vector<16x16x8xbf16>
    %13 = vector.shape_cast %12 : vector<16x16x8xbf16> to vector<256x8xbf16>
    %c1 = arith.constant 1 : index
    %c0_6 = arith.constant 0 : index
    %c0_7 = arith.constant 0 : index
    %14 = vector.load %arg4[%c1, %c0_6, %c0_7] : memref<9x8x8xbf16, #tpu.memory_space<vmem>>, vector<1x8x8xbf16>
    %15 = vector.shape_cast %14 : vector<1x8x8xbf16> to vector<8x8xbf16>
    %cst_8 = arith.constant dense<0.000000e+00> : vector<256x8xf32>
    %16 = tpu.matmul %13, %15, %cst_8 {dimension_numbers = #tpu.dot_dimension_numbers<[1], [0], [0], [1], [0, 0, 1, 1], [], []>} : vector<256x8xbf16>, vector<8x8xbf16>, vector<256x8xf32> -> vector<256x8xf32>
    %17 = arith.addf %11, %16 : vector<256x8xf32>
    %18 = vector.extract_strided_slice %4 {offsets = [0, 2, 0], sizes = [16, 16, 8], strides = [1, 1, 1]} : vector<18x18x8xbf16> to vector<16x16x8xbf16>
    %19 = vector.shape_cast %18 : vector<16x16x8xbf16> to vector<256x8xbf16>
    %c2 = arith.constant 2 : index
    %c0_9 = arith.constant 0 : index
    %c0_10 = arith.constant 0 : index
    %20 = vector.load %arg4[%c2, %c0_9, %c0_10] : memref<9x8x8xbf16, #tpu.memory_space<vmem>>, vector<1x8x8xbf16>
    %21 = vector.shape_cast %20 : vector<1x8x8xbf16> to vector<8x8xbf16>
    %cst_11 = arith.constant dense<0.000000e+00> : vector<256x8xf32>
    %22 = tpu.matmul %19, %21, %cst_11 {dimension_numbers = #tpu.dot_dimension_numbers<[1], [0], [0], [1], [0, 0, 1, 1], [], []>} : vector<256x8xbf16>, vector<8x8xbf16>, vector<256x8xf32> -> vector<256x8xf32>
    %23 = arith.addf %17, %22 : vector<256x8xf32>
    %24 = vector.extract_strided_slice %4 {offsets = [1, 0, 0], sizes = [16, 16, 8], strides = [1, 1, 1]} : vector<18x18x8xbf16> to vector<16x16x8xbf16>
    %25 = vector.shape_cast %24 : vector<16x16x8xbf16> to vector<256x8xbf16>
    %c3 = arith.constant 3 : index
    %c0_12 = arith.constant 0 : index
    %c0_13 = arith.constant 0 : index
    %26 = vector.load %arg4[%c3, %c0_12, %c0_13] : memref<9x8x8xbf16, #tpu.memory_space<vmem>>, vector<1x8x8xbf16>
    %27 = vector.shape_cast %26 : vector<1x8x8xbf16> to vector<8x8xbf16>
    %cst_14 = arith.constant dense<0.000000e+00> : vector<256x8xf32>
    %28 = tpu.matmul %25, %27, %cst_14 {dimension_numbers = #tpu.dot_dimension_numbers<[1], [0], [0], [1], [0, 0, 1, 1], [], []>} : vector<256x8xbf16>, vector<8x8xbf16>, vector<256x8xf32> -> vector<256x8xf32>
    %29 = arith.addf %23, %28 : vector<256x8xf32>
    %30 = vector.extract_strided_slice %4 {offsets = [1, 1, 0], sizes = [16, 16, 8], strides = [1, 1, 1]} : vector<18x18x8xbf16> to vector<16x16x8xbf16>
    %31 = vector.shape_cast %30 : vector<16x16x8xbf16> to vector<256x8xbf16>
    %c4 = arith.constant 4 : index
    %c0_15 = arith.constant 0 : index
    %c0_16 = arith.constant 0 : index
    %32 = vector.load %arg4[%c4, %c0_15, %c0_16] : memref<9x8x8xbf16, #tpu.memory_space<vmem>>, vector<1x8x8xbf16>
    %33 = vector.shape_cast %32 : vector<1x8x8xbf16> to vector<8x8xbf16>
    %cst_17 = arith.constant dense<0.000000e+00> : vector<256x8xf32>
    %34 = tpu.matmul %31, %33, %cst_17 {dimension_numbers = #tpu.dot_dimension_numbers<[1], [0], [0], [1], [0, 0, 1, 1], [], []>} : vector<256x8xbf16>, vector<8x8xbf16>, vector<256x8xf32> -> vector<256x8xf32>
    %35 = arith.addf %29, %34 : vector<256x8xf32>
    %36 = vector.extract_strided_slice %4 {offsets = [1, 2, 0], sizes = [16, 16, 8], strides = [1, 1, 1]} : vector<18x18x8xbf16> to vector<16x16x8xbf16>
    %37 = vector.shape_cast %36 : vector<16x16x8xbf16> to vector<256x8xbf16>
    %c5 = arith.constant 5 : index
    %c0_18 = arith.constant 0 : index
    %c0_19 = arith.constant 0 : index
    %38 = vector.load %arg4[%c5, %c0_18, %c0_19] : memref<9x8x8xbf16, #tpu.memory_space<vmem>>, vector<1x8x8xbf16>
    %39 = vector.shape_cast %38 : vector<1x8x8xbf16> to vector<8x8xbf16>
    %cst_20 = arith.constant dense<0.000000e+00> : vector<256x8xf32>
    %40 = tpu.matmul %37, %39, %cst_20 {dimension_numbers = #tpu.dot_dimension_numbers<[1], [0], [0], [1], [0, 0, 1, 1], [], []>} : vector<256x8xbf16>, vector<8x8xbf16>, vector<256x8xf32> -> vector<256x8xf32>
    %41 = arith.addf %35, %40 : vector<256x8xf32>
    %42 = vector.extract_strided_slice %4 {offsets = [2, 0, 0], sizes = [16, 16, 8], strides = [1, 1, 1]} : vector<18x18x8xbf16> to vector<16x16x8xbf16>
    %43 = vector.shape_cast %42 : vector<16x16x8xbf16> to vector<256x8xbf16>
    %c6 = arith.constant 6 : index
    %c0_21 = arith.constant 0 : index
    %c0_22 = arith.constant 0 : index
    %44 = vector.load %arg4[%c6, %c0_21, %c0_22] : memref<9x8x8xbf16, #tpu.memory_space<vmem>>, vector<1x8x8xbf16>
    %45 = vector.shape_cast %44 : vector<1x8x8xbf16> to vector<8x8xbf16>
    %cst_23 = arith.constant dense<0.000000e+00> : vector<256x8xf32>
    %46 = tpu.matmul %43, %45, %cst_23 {dimension_numbers = #tpu.dot_dimension_numbers<[1], [0], [0], [1], [0, 0, 1, 1], [], []>} : vector<256x8xbf16>, vector<8x8xbf16>, vector<256x8xf32> -> vector<256x8xf32>
    %47 = arith.addf %41, %46 : vector<256x8xf32>
    %48 = vector.extract_strided_slice %4 {offsets = [2, 1, 0], sizes = [16, 16, 8], strides = [1, 1, 1]} : vector<18x18x8xbf16> to vector<16x16x8xbf16>
    %49 = vector.shape_cast %48 : vector<16x16x8xbf16> to vector<256x8xbf16>
    %c7 = arith.constant 7 : index
    %c0_24 = arith.constant 0 : index
    %c0_25 = arith.constant 0 : index
    %50 = vector.load %arg4[%c7, %c0_24, %c0_25] : memref<9x8x8xbf16, #tpu.memory_space<vmem>>, vector<1x8x8xbf16>
    %51 = vector.shape_cast %50 : vector<1x8x8xbf16> to vector<8x8xbf16>
    %cst_26 = arith.constant dense<0.000000e+00> : vector<256x8xf32>
    %52 = tpu.matmul %49, %51, %cst_26 {dimension_numbers = #tpu.dot_dimension_numbers<[1], [0], [0], [1], [0, 0, 1, 1], [], []>} : vector<256x8xbf16>, vector<8x8xbf16>, vector<256x8xf32> -> vector<256x8xf32>
    %53 = arith.addf %47, %52 : vector<256x8xf32>
    %54 = vector.extract_strided_slice %4 {offsets = [2, 2, 0], sizes = [16, 16, 8], strides = [1, 1, 1]} : vector<18x18x8xbf16> to vector<16x16x8xbf16>
    %55 = vector.shape_cast %54 : vector<16x16x8xbf16> to vector<256x8xbf16>
    %c8 = arith.constant 8 : index
    %c0_27 = arith.constant 0 : index
    %c0_28 = arith.constant 0 : index
    %56 = vector.load %arg4[%c8, %c0_27, %c0_28] : memref<9x8x8xbf16, #tpu.memory_space<vmem>>, vector<1x8x8xbf16>
    %57 = vector.shape_cast %56 : vector<1x8x8xbf16> to vector<8x8xbf16>
    %cst_29 = arith.constant dense<0.000000e+00> : vector<256x8xf32>
    %58 = tpu.matmul %55, %57, %cst_29 {dimension_numbers = #tpu.dot_dimension_numbers<[1], [0], [0], [1], [0, 0, 1, 1], [], []>} : vector<256x8xbf16>, vector<8x8xbf16>, vector<256x8xf32> -> vector<256x8xf32>
    %59 = arith.addf %53, %58 : vector<256x8xf32>
    %c0_30 = arith.constant 0 : index
    %c0_31 = arith.constant 0 : index
    %60 = vector.load %arg5[%c0_30, %c0_31] : memref<1x8xf32, #tpu.memory_space<vmem>>, vector<1x8xf32>
    %61 = vector.shape_cast %60 : vector<1x8xf32> to vector<8xf32>
    %62 = vector.shape_cast %61 : vector<8xf32> to vector<1x8xf32>
    %63 = vector.broadcast %62 : vector<1x8xf32> to vector<256x8xf32>
    %64 = arith.addf %59, %63 : vector<256x8xf32>
    %cst_32 = arith.constant 0.000000e+00 : f32
    %cst_33 = arith.constant 6.000000e+00 : f32
    %65 = vector.broadcast %cst_32 : f32 to vector<256x8xf32>
    %66 = arith.maximumf %65, %64 : vector<256x8xf32>
    %67 = vector.broadcast %cst_33 : f32 to vector<256x8xf32>
    %68 = arith.minimumf %67, %66 : vector<256x8xf32>
    %69 = vector.shape_cast %68 : vector<256x8xf32> to vector<16x16x8xf32>
    %c0_34 = arith.constant 0 : index
    %c0_35 = arith.constant 0 : index
    %c0_36 = arith.constant 0 : index
    %c0_37 = arith.constant 0 : index
    %70 = vector.load %arg6[%c0_34, %c0_35, %c0_36, %c0_37] : memref<1x16x16x8xf32, #tpu.memory_space<vmem>>, vector<1x16x16x8xf32>
    %71 = vector.shape_cast %70 : vector<1x16x16x8xf32> to vector<16x16x8xf32>
    %72 = vector.shape_cast %69 : vector<16x16x8xf32> to vector<1x16x16x8xf32>
    tpu.vector_store %arg6[%c0_34, %c0_35, %c0_36, %c0_37], %72 {strides = array<i32>} : memref<1x16x16x8xf32, #tpu.memory_space<vmem>>, vector<1x16x16x8xf32>,
    return
  }
  func.func @transform_0(%arg0: i32, %arg1: i32, %arg2: i32) -> (i32, i32, i32, i32) {
    %c0_i32 = arith.constant 0 : i32
    %c0_i32_0 = arith.constant 0 : i32
    %c0_i32_1 = arith.constant 0 : i32
    %c0_i32_2 = arith.constant 0 : i32
    return %arg0, %c0_i32, %c0_i32_0, %c0_i32_1 : i32, i32, i32, i32
  }
  func.func @transform_1(%arg0: i32, %arg1: i32, %arg2: i32) -> (i32, i32, i32) {
    %c0_i32 = arith.constant 0 : i32
    %c0_i32_0 = arith.constant 0 : i32
    %c0_i32_1 = arith.constant 0 : i32
    return %c0_i32, %c0_i32_0, %arg1 : i32, i32, i32
  }
  func.func @transform_2(%arg0: i32, %arg1: i32, %arg2: i32) -> (i32, i32) {
    %c0_i32 = arith.constant 0 : i32
    %c0_i32_0 = arith.constant 0 : i32
    return %c0_i32, %arg1 : i32, i32
  }
  func.func @transform_3(%arg0: i32, %arg1: i32, %arg2: i32) -> (i32, i32, i32, i32) {
    %c0_i32 = arith.constant 0 : i32
    %c0_i32_0 = arith.constant 0 : i32
    return %arg0, %arg2, %c0_i32, %arg1 : i32, i32, i32, i32
  }
}

</mosaic_0001>

<bundles_post_ra>
// kernel: tpu_custom_call.1
= control target key start
LH: loop header
LB: loop body
LE: loop exit
PB: predicated region body
PF: predicated region fallthrough
CT: control target
= control target key end

     0   :  { %s2929_s12 = smov 0   ;;  %s2931_s13 = smov 0   ;;  %s4114_s0 = inlined_call_operand.vmem [shape: bf16[2,18,18,8], index: 0, kind: input, shape index: {}]   ;;  %s4115_s1 = inlined_call_operand.vmem [shape: bf16[9,8,8], index: 1, kind: input, shape index: {}]   ;;  %s4116_s2 = inlined_call_operand.vmem [shape: f32[1,8], index: 2, kind: input, shape index: {}]   ;;  %s4117_s3 = inlined_call_operand.vmem [shape: f32[2,16,16,8], index: 3, kind: output, shape index: {}]  }
   0x1   :  { %s2933_s14 = smov 0  }
   0x2 LB: > { %s32_s15 = sadd.s32 1, %s2903_s13  ;;  %p2581_p0 = scmp.ge.s32.totalorder %s2907_s14, 1  ;;  %s2907_s14 = sphi %s2933_s14, %s13_s14   ;;  %s2903_s13 = sphi %s2931_s13, %s4257_s13   ;;  %s2899_s12 = sphi %s2929_s12, %s4256_s12  }
   0x3   : > { %p34_p1 = scmp.ge.s32.totalorder %s32_s15, 2  ;;  %p177_p2 = scmp.lt.s32.totalorder %s2907_s14, 3 }
   0x5   : > { %s4259_s15 = smov (%p34_p1, %s32_s15), 0  ;;  %p178_p3 = pnand %p2581_p0, %p177_p2 }
   0x7   : > { %181 = sbr.rel (%p178_p3) target bundleno = 761 (0x2f9), region = 32 }
   0xc   : > { %v2585_v0 = vld [vmem:[%s4115_s1 + $0x4] sm:$0xf]  ;;  %vm788_vm0 = vcmask 1043456   ;;  %p216_p4 = scmp.lt.s32.totalorder %s2899_s12, 1  ;;  %v2698_v2 = vld [vmem:[%s4115_s1 + $0x8] sm:$0xf] }
   0xd   : > { %v790_v1 = vsel %vm788_vm0, %v2585_v0, 0  ;;  %v1331_v3 = vsel %vm788_vm0, %v2698_v2, 0  ;;  %v2715_v4 = vld [vmem:[%s4115_s1 + $0xc] sm:$0xf]  ;;  %v301_v5 = vld [vmem:[%s4115_s1] sm:$0xf] }
   0xe   : > { %2848 = vmatpush.bf16.msra.mxu1 %v790_v1  ;;  %2849 = vmatpush.bf16.msra.mxu2 %v790_v1  ;;  %s4261_s12 = smov (!%p216_p4, %s2899_s12), 1  ;;  %v2736_v6 = vld [vmem:[%s4115_s1 + $0x10] sm:$0xf]  ;;  %v1465_v7 = vsel %vm788_vm0, %v2715_v4, 0  ;;  %v1010_v8 = vsel %vm788_vm0, %v301_v5, 0  ;;  %vm739_vm4 = vcmask 64512  }
   0xf   : > { %2850 = vmatpush.bf16.msra.mxu3 %v790_v1  ;;  %799 = vmatpush.bf16.msra.mxu0 %v790_v1  ;;  %s2851_s26 = smul.u32 216, %s4261_s12  ;;  %v1621_v9 = vsel %vm788_vm0, %v2736_v6, 0  ;;  %vm302_vm1 = vsmask.f32 3328  ;;  %vm303_vm2 = vsmask.f32 7440 }
  0x10   : > { %vm3000_vm3 = vmor %vm302_vm1, %vm303_vm2  ;;  %vm1117_vm5 = vcmask 1042432   ;;  %vm1118_vm6 = vcmask 1046532   ;;  %s2829_s17 = sshll.u32 %s4261_s12, 8 }
  0x11   : > { %s2973_s29 = scalar_lea.vmem %s4114_s0, %s2851_s26  ;;  %vm3303_vm7 = vmor %vm1117_vm5, %vm1118_vm6  ;;  %s3900_s20 = scalar_lea.vmem %s4117_s3, %s2829_s17 }
  0x12   : > { %1340 = vmatpush.bf16.msrb.mxu2 %v1331_v3  ;;  %1019 = vmatpush.bf16.msrb.mxu1 %v1010_v8  ;;  %v2976_v10 = vld [vmem:[%s2973_s29 + $0x30] sm:$0xf]  ;;  %v2979_v11 = vld [vmem:[%s2973_s29 + $0x34] sm:$0xf]  ;;  %v2982_v12 = vld [vmem:[%s2973_s29 + $0x38] sm:$0x1] }
  0x13   : > { %1474 = vmatpush.bf16.msrb.mxu3 %v1465_v7  ;;  %1630 = vmatpush.bf16.msrb.mxu0 %v1621_v9  ;;  %v402_v13 = vshrl.u32 %v2976_v10, 16  ;;  %v405_v14 = vshll.u32 %v2976_v10, 16  ;;  %v411_v15 = vshll.u32 %v2979_v11, 16  ;;  %v415_v16 = vshrl.u32 %v2979_v11, 16  ;;  %v271_v17 = vld [vmem:[%s2973_s29 + $0x60] sm:$0xf] }
  0x14   : > { %v421_v18 = vshll.u32 %v2982_v12, 16  ;;  %v2991_v19 = vld [vmem:[%s2973_s29 + $0x64] sm:$0xf]  ;;  %v273_v20 = vld [vmem:[%s2973_s29 + $0x68] sm:$0x1]  ;;  %v498_v21 = vshrl.u32 %v271_v17, 16 }
  0x15   : > { %v404_v22 = vrot.slane %v402_v13, 4  ;;  %v407_v23 = vrot.slane %v405_v14, 5  ;;  %v413_v24 = vrot.slane %v411_v15, 5  ;;  %v417_v25 = vrot.slane %v415_v16, 4  ;;  %v283_v26 = vld [vmem:[%s2973_s29 + $0x90] sm:$0xf] }
  0x16   : > { %v423_v27 = vrot.slane %v421_v18, 5  ;;  %v500_v28 = vrot.slane %v498_v21, 4  ;;  %v501_v29 = vshll.u32 %v271_v17, 16  ;;  %v507_v30 = vshll.u32 %v2991_v19, 16  ;;  %v284_v35 = vld [vmem:[%s2973_s29 + $0x94] sm:$0xf] }
  0x17   : > { %v408_v31 = vor.u32 %v407_v23, %v404_v22  ;;  %v418_v32 = vor.u32 %v417_v25, %v413_v24  ;;  %v511_v33 = vshrl.u32 %v2991_v19, 16  ;;  %v517_v34 = vshll.u32 %v273_v20, 16  ;;  %v285_v45 = vld [vmem:[%s2973_s29 + $0x98] sm:$0x1]  ;;  %v3010_v61 = vld [vmem:[%s2973_s29] sm:$0xf] }
  0x18   : > { %v503_v37 = vrot.slane %v501_v29, 5  ;;  %v509_v38 = vrot.slane %v507_v30, 5  ;;  %v594_v39 = vshrl.u32 %v283_v26, 16  ;;  %v597_v47 = vshll.u32 %v283_v26, 16  ;;  %v3017_v1 = vld [vmem:[%s2973_s29 + $0x4] sm:$0xf] }
  0x19   : > { %v409_v40 = vrot.slane %v408_v31, 4  ;;  %v419_v41 = vrot.slane %v418_v32, 4  ;;  %v513_v42 = vrot.slane %v511_v33, 4  ;;  %v519_v43 = vrot.slane %v517_v34, 5  ;;  %v3020_v2 = vld [vmem:[%s2973_s29 + $0x8] sm:$0x1] }
  0x1a   : > { %v504_v44 = vor.u32 %v503_v37, %v500_v28  ;;  %v596_v46 = vrot.slane %v594_v39, 4  ;;  %v603_v48 = vshll.u32 %v284_v35, 16  ;;  %v607_v52 = vshrl.u32 %v284_v35, 16  ;;  %v3036_v23 = vld [vmem:[%s2973_s29 + $0x3c] sm:$0xf] }
  0x1b   : > { %v414_v49 = vsel %vm3000_vm3, %v409_v40, %v413_v24  ;;  %v424_v50 = vsel %vm3000_vm3, %v419_v41, %v423_v27  ;;  %v514_v51 = vor.u32 %v513_v42, %v509_v38  ;;  %v599_v56 = vrot.slane %v597_v47, 5  ;;  %v3039_v24 = vld [vmem:[%s2973_s29 + $0x40] sm:$0xf]  ;;  %v3044_v29 = vld [vmem:[%s2973_s29 + $0x44] sm:$0x1] }
  0x1c   : > { %v699_v53 = vunpack.c.l.b16 %v414_v49  ;;  %v700_v54 = vunpack.c.l.b16 %v424_v50  ;;  %v505_v55 = vrot.slane %v504_v44, 4  ;;  %v605_v58 = vrot.slane %v603_v48, 5  ;;  %v3059_v47 = vld [vmem:[%s2973_s29 + $0x70] sm:$0xf] }
  0x1d   : > { %v515_v57 = vrot.slane %v514_v51, 4  ;;  %v609_v59 = vrot.slane %v607_v52, 4  ;;  %v613_v60 = vshll.u32 %v285_v45, 16  ;;  %v600_v0 = vor.u32 %v599_v56, %v596_v46  ;;  %v3066_v51 = vld [vmem:[%s2973_s29 + $0x74] sm:$0x1] }
  0x1e   : > { %v3012_v62 = vpack.c.b16 %v700_v54, %v699_v53  ;;  %v510_v63 = vsel %vm3000_vm3, %v505_v55, %v509_v38  ;;  %v306_v9 = vshrl.u32 %v3010_v61, 16  ;;  %v309_v13 = vshll.u32 %v3010_v61, 16  ;;  %v3052_v38 = vld [vmem:[%s2973_s29 + $0x6c] sm:$0xf] }
  0x1f   : > { %v520_v3 = vsel %vm3000_vm3, %v515_v57, %v519_v43  ;;  %v707_v4 = vunpack.c.l.b16 %v510_v63  ;;  %v610_v5 = vor.u32 %v609_v59, %v605_v58  ;;  %v615_v6 = vrot.slane %v613_v60, 5 }
  0x20   : > { %2590 = vmatmul.msk.bf16.vlgmr.msra.gmra.mxu1 %vm739_vm4, %v3012_v62  ;;  %v708_v7 = vunpack.c.l.b16 %v520_v3  ;;  %v601_v8 = vrot.slane %v600_v0, 4  ;;  %v315_v15 = vshll.u32 %v3017_v1, 16  ;;  %v319_v16 = vshrl.u32 %v3017_v1, 16 }
  0x21   : > { %v611_v14 = vrot.slane %v610_v5, 4  ;;  %v325_v17 = vshll.u32 %v3020_v2, 16  ;;  %v308_v21 = vrot.slane %v306_v9, 4  ;;  %v311_v22 = vrot.slane %v309_v13, 5  ;;  %v286_v5 = vld [vmem:[%s2973_s29 + $0x9c] sm:$0xf] }
  0x22   : > { %v3031_v18 = vpack.c.b16 %v708_v7, %v707_v4  ;;  %v606_v20 = vsel %vm3000_vm3, %v601_v8, %v605_v58  ;;  %v317_v27 = vrot.slane %v315_v15, 5  ;;  %v321_v28 = vrot.slane %v319_v16, 4  ;;  %v287_v9 = vld [vmem:[%s2973_s29 + $0xa0] sm:$0xf] }
  0x23   : > { %v616_v25 = vsel %vm3000_vm3, %v611_v14, %v615_v6  ;;  %v715_v26 = vunpack.c.l.b16 %v606_v20  ;;  %v312_v31 = vor.u32 %v311_v22, %v308_v21  ;;  %v327_v32 = vrot.slane %v325_v17, 5  ;;  %v288_v17 = vld [vmem:[%s2973_s29 + $0xa4] sm:$0x1] }
  0x24   : > { %4160 = vst [vmem:[#allocation2_spill] sm:$0xff] %v3031_v18  ;;  %2594 = vmatmul.msk.bf16.vlgmr.msra.gmra.mxu2 %vm739_vm4, %v3031_v18  ;;  %v716_v30 = vunpack.c.l.b16 %v616_v25  ;;  %v322_v33 = vor.u32 %v321_v28, %v317_v27  ;;  %v426_v34 = vshrl.u32 %v3036_v23, 16  ;;  %v429_v35 = vshll.u32 %v3036_v23, 16 }
  0x25   : > { %v435_v37 = vshll.u32 %v3039_v24, 16  ;;  %v313_v40 = vrot.slane %v312_v31, 4  ;;  %v439_v41 = vshrl.u32 %v3039_v24, 16  ;;  %v445_v42 = vshll.u32 %v3044_v29, 16 }
  0x26   : > { %v3054_v39 = vpack.c.b16 %v716_v30, %v715_v26  ;;  %v323_v43 = vrot.slane %v322_v33, 4  ;;  %v428_v44 = vrot.slane %v426_v34, 4  ;;  %v431_v45 = vrot.slane %v429_v35, 5  ;;  %v3084_v35 = vld [vmem:[%s2973_s29 + $0xc] sm:$0xf] }
  0x27   : > { %v437_v46 = vrot.slane %v435_v37, 5  ;;  %v318_v48 = vsel %vm3000_vm3, %v313_v40, %v317_v27  ;;  %v441_v49 = vrot.slane %v439_v41, 4  ;;  %v447_v50 = vrot.slane %v445_v42, 5 }
  0x28   : > { %4161 = vst [vmem:[#allocation3_spill] sm:$0xff] %v3054_v39  ;;  %2598 = vmatmul.msk.bf16.vlgmr.msra.gmra.mxu3 %vm739_vm4, %v3054_v39  ;;  %v522_v52 = vshrl.u32 %v3052_v38, 16  ;;  %v328_v53 = vsel %vm3000_vm3, %v323_v43, %v327_v32  ;;  %v691_v54 = vunpack.c.l.b16 %v318_v48  ;;  %v432_v55 = vor.u32 %v431_v45, %v428_v44  ;;  %v3091_v43 = vld [vmem:[%s2973_s29 + $0x10] sm:$0xf]  ;;  %v3094_v48 = vld [vmem:[%s2973_s29 + $0x14] sm:$0x1] }
  0x29   : > { %v525_v56 = vshll.u32 %v3052_v38, 16  ;;  %v692_v57 = vunpack.c.l.b16 %v328_v53  ;;  %v442_v58 = vor.u32 %v441_v49, %v437_v46  ;;  %v531_v60 = vshll.u32 %v3059_v47, 16  ;;  %v3271_v39 = vld [vmem:[%s2973_s29 + $0x2c] sm:$0x1] }
  0x2a   : > { %v524_v59 = vrot.slane %v522_v52, 4  ;;  %v433_v63 = vrot.slane %v432_v55, 4  ;;  %v535_v3 = vshrl.u32 %v3059_v47, 16  ;;  %v541_v4 = vshll.u32 %v3066_v51, 16 }
  0x2b   : > { %v527_v0 = vrot.slane %v525_v56, 5  ;;  %v723_v6 = vpack.c.b16 %v692_v57, %v691_v54  ;;  %v443_v7 = vrot.slane %v442_v58, 4  ;;  %v533_v8 = vrot.slane %v531_v60, 5  ;;  %v3104_v58 = vld [vmem:[%s2973_s29 + $0x48] sm:$0xf] }
  0x2c   : > { %v438_v13 = vsel %vm3000_vm3, %v433_v63, %v437_v46  ;;  %v537_v15 = vrot.slane %v535_v3, 4  ;;  %v543_v16 = vrot.slane %v541_v4, 5  ;;  %v618_v22 = vshrl.u32 %v286_v5, 16  ;;  %v3109_v3 = vld [vmem:[%s2973_s29 + $0x4c] sm:$0xf] }
  0x2d   : > { %v528_v14 = vor.u32 %v527_v0, %v524_v59  ;;  %2586 = vmatmul.msk.bf16.vlgmr.msra.gmra.mxu0 %vm739_vm4, %v723_v6  ;;  %v448_v20 = vsel %vm3000_vm3, %v443_v7, %v447_v50  ;;  %v701_v21 = vunpack.c.l.b16 %v438_v13  ;;  %v621_v25 = vshll.u32 %v286_v5, 16 }
  0x2e   : > { %v702_v26 = vunpack.c.l.b16 %v448_v20  ;;  %v538_v28 = vor.u32 %v537_v15, %v533_v8  ;;  %v627_v30 = vshll.u32 %v287_v9, 16  ;;  %v620_v31 = vrot.slane %v618_v22, 4  ;;  %v3116_v15 = vld [vmem:[%s2973_s29 + $0x50] sm:$0x1] }
  0x2f   : > { %v529_v27 = vrot.slane %v528_v14, 4  ;;  %v623_v32 = vrot.slane %v621_v25, 5  ;;  %v631_v33 = vshrl.u32 %v287_v9, 16  ;;  %v637_v34 = vshll.u32 %v288_v17, 16 }
  0x30   : > { %v3086_v37 = vpack.c.b16 %v702_v26, %v701_v21  ;;  %v539_v41 = vrot.slane %v538_v28, 4  ;;  %v629_v42 = vrot.slane %v627_v30, 5  ;;  %v330_v52 = vshrl.u32 %v3084_v35, 16  ;;  %v3127_v28 = vld [vmem:[%s2973_s29 + $0x78] sm:$0xf] }
  0x31   : > { %v534_v40 = vsel %vm3000_vm3, %v529_v27, %v533_v8  ;;  %v624_v45 = vor.u32 %v623_v32, %v620_v31  ;;  %v633_v46 = vrot.slane %v631_v33, 4  ;;  %v639_v50 = vrot.slane %v637_v34, 5  ;;  %v3131_v34 = vld [vmem:[%s2973_s29 + $0x7c] sm:$0xf] }
  0x32   : > { %v709_v44 = vunpack.c.l.b16 %v534_v40  ;;  %2591 = vmatmul.msk.bf16.gmra.mxu1 %vm739_vm4, %v3086_v37  ;;  %v544_v49 = vsel %vm3000_vm3, %v539_v41, %v543_v16  ;;  %v333_v53 = vshll.u32 %v3084_v35, 16  ;;  %v339_v57 = vshll.u32 %v3091_v43, 16 }
  0x33   : > { %v710_v54 = vunpack.c.l.b16 %v544_v49  ;;  %v625_v55 = vrot.slane %v624_v45, 4  ;;  %v634_v56 = vor.u32 %v633_v46, %v629_v42  ;;  %v332_v59 = vrot.slane %v330_v52, 4 }
  0x34   : > { %v335_v60 = vrot.slane %v333_v53, 5  ;;  %v343_v63 = vshrl.u32 %v3091_v43, 16  ;;  %v349_v0 = vshll.u32 %v3094_v48, 16  ;;  %v341_v7 = vrot.slane %v339_v57, 5 }
  0x35   : > { %v3111_v4 = vpack.c.b16 %v710_v54, %v709_v44  ;;  %v630_v5 = vsel %vm3000_vm3, %v625_v55, %v629_v42  ;;  %v635_v6 = vrot.slane %v634_v56, 4  ;;  %v450_v17 = vshrl.u32 %v3104_v58, 16 }
  0x36   : > { %v717_v8 = vunpack.c.l.b16 %v630_v5  ;;  %v336_v9 = vor.u32 %v335_v60, %v332_v59  ;;  %v345_v13 = vrot.slane %v343_v63, 4  ;;  %v351_v14 = vrot.slane %v349_v0, 5 }
  0x37   : > { %2595 = vmatmul.msk.bf16.gmra.mxu2 %vm739_vm4, %v3111_v4  ;;  %v640_v16 = vsel %vm3000_vm3, %v635_v6, %v639_v50  ;;  %v453_v20 = vshll.u32 %v3104_v58, 16  ;;  %v459_v21 = vshll.u32 %v3109_v3, 16  ;;  %v463_v27 = vshrl.u32 %v3109_v3, 16  ;;  %v3138_v50 = vld [vmem:[%s2973_s29 + $0x80] sm:$0x1] }
  0x38   : > { %v718_v22 = vunpack.c.l.b16 %v640_v16  ;;  %v337_v25 = vrot.slane %v336_v9, 4  ;;  %v346_v26 = vor.u32 %v345_v13, %v341_v7  ;;  %v452_v30 = vrot.slane %v450_v17, 4  ;;  %v3157_v16 = vld [vmem:[%s2973_s29 + $0xac] sm:$0xf]  ;;  %v3160_v17 = vld [vmem:[%s2973_s29 + $0xb0] sm:$0x1] }
  0x39   : > { %v455_v31 = vrot.slane %v453_v20, 5  ;;  %v461_v32 = vrot.slane %v459_v21, 5  ;;  %v469_v33 = vshll.u32 %v3116_v15, 16  ;;  %v465_v44 = vrot.slane %v463_v27, 4  ;;  %4164 = vst [vmem:[#allocation6_spill] sm:$0xff] %v3157_v16 }
  0x3a   : > { %v3133_v40 = vpack.c.b16 %v718_v22, %v717_v8  ;;  %v342_v41 = vsel %vm3000_vm3, %v337_v25, %v341_v7  ;;  %v347_v42 = vrot.slane %v346_v26, 4  ;;  %v546_v52 = vshrl.u32 %v3127_v28, 16  ;;  %v3150_v8 = vld [vmem:[%s2973_s29 + $0xa8] sm:$0xf]  ;;  %4165 = vst [vmem:[#allocation7_spill] sm:$0xff] %v3160_v17 }
  0x3b   : > { %v693_v45 = vunpack.c.l.b16 %v342_v41  ;;  %v456_v46 = vor.u32 %v455_v31, %v452_v30  ;;  %v471_v49 = vrot.slane %v469_v33, 5  ;;  %v466_v54 = vor.u32 %v465_v44, %v461_v32  ;;  %4163 = vst [vmem:[#allocation5_spill] sm:$0xff] %v3150_v8 }
  0x3c   : > { %4162 = vst [vmem:[#allocation4_spill] sm:$0xff] %v3133_v40  ;;  %2599 = vmatmul.msk.bf16.gmra.mxu3 %vm739_vm4, %v3133_v40  ;;  %v352_v53 = vsel %vm3000_vm3, %v347_v42, %v351_v14  ;;  %v549_v55 = vshll.u32 %v3127_v28, 16  ;;  %v555_v56 = vshll.u32 %v3131_v34, 16  ;;  %v548_v60 = vrot.slane %v546_v52, 4  ;;  %v3174_v52 = vld [vmem:[%s2973_s29 + $0x18] sm:$0xf] }
  0x3d   : > { %v694_v57 = vunpack.c.l.b16 %v352_v53  ;;  %v457_v59 = vrot.slane %v456_v46, 4  ;;  %v559_v63 = vshrl.u32 %v3131_v34, 16  ;;  %v467_v0 = vrot.slane %v466_v54, 4  ;;  %v3260_v40 = vld [vmem:[%s2973_s29 + $0x24] sm:$0xf] }
  0x3e   : > { %v551_v5 = vrot.slane %v549_v55, 5  ;;  %v557_v6 = vrot.slane %v555_v56, 5  ;;  %v565_v7 = vshll.u32 %v3138_v50, 16  ;;  %v642_v30 = vshrl.u32 %v3150_v8, 16  ;;  %v3179_v56 = vld [vmem:[%s2973_s29 + $0x1c] sm:$0xf] }
  0x3f   : > { %v3152_v9 = vpack.c.b16 %v694_v57, %v693_v45  ;;  %v462_v13 = vsel %vm3000_vm3, %v457_v59, %v461_v32  ;;  %v561_v14 = vrot.slane %v559_v63, 4  ;;  %v472_v20 = vsel %vm3000_vm3, %v467_v0, %v471_v49  ;;  %v3182_v57 = vld [vmem:[%s2973_s29 + $0x20] sm:$0x1] }
  0x40   : > { %v703_v21 = vunpack.c.l.b16 %v462_v13  ;;  %v552_v22 = vor.u32 %v551_v5, %v548_v60  ;;  %v567_v25 = vrot.slane %v565_v7, 5  ;;  %v704_v26 = vunpack.c.l.b16 %v472_v20 }
  0x41   : > { %2587 = vmatmul.msk.bf16.gmra.mxu0 %vm739_vm4, %v3152_v9  ;;  %v562_v27 = vor.u32 %v561_v14, %v557_v6  ;;  %v645_v31 = vshll.u32 %v3150_v8, 16  ;;  %v651_v33 = vshll.u32 %v3157_v16, 16  ;;  %v655_v41 = vshrl.u32 %v3157_v16, 16 }
  0x42   : > { %v553_v32 = vrot.slane %v552_v22, 4  ;;  %v661_v42 = vshll.u32 %v3160_v17, 16  ;;  %v3171_v44 = vpack.c.b16 %v704_v26, %v703_v21  ;;  %v644_v46 = vrot.slane %v642_v30, 4  ;;  %v3194_v26 = vld [vmem:[%s2973_s29 + $0x54] sm:$0xf] }
  0x43   : > { %v563_v45 = vrot.slane %v562_v27, 4  ;;  %v647_v49 = vrot.slane %v645_v31, 5  ;;  %v653_v54 = vrot.slane %v651_v33, 5  ;;  %v657_v55 = vrot.slane %v655_v41, 4  ;;  %v3238_v17 = vld [vmem:[%s2973_s29 + $0xb4] sm:$0xf] }
  0x44   : > { %4166 = vst [vmem:[#allocation8_spill] sm:$0xff] %v3171_v44  ;;  %v558_v53 = vsel %vm3000_vm3, %v553_v32, %v557_v6  ;;  %2592 = vmatmul.msk.bf16.gmra.mxu1 %vm739_vm4, %v3171_v44  ;;  %v663_v0 = vrot.slane %v661_v42, 5  ;;  %v354_v6 = vshrl.u32 %v3174_v52, 16  ;;  %v357_v13 = vshll.u32 %v3174_v52, 16  ;;  %v3199_v32 = vld [vmem:[%s2973_s29 + $0x58] sm:$0xf] }
  0x45   : > { %v568_v59 = vsel %vm3000_vm3, %v563_v45, %v567_v25  ;;  %v711_v60 = vunpack.c.l.b16 %v558_v53  ;;  %v648_v63 = vor.u32 %v647_v49, %v644_v46  ;;  %v658_v7 = vor.u32 %v657_v55, %v653_v54  ;;  %v3204_v46 = vld [vmem:[%s2973_s29 + $0x5c] sm:$0x1]  ;;  %4169 = vst [vmem:[#allocation11_spill] sm:$0xff] %v3238_v17 }
  0x46   : > { %v712_v5 = vunpack.c.l.b16 %v568_v59  ;;  %v363_v20 = vshll.u32 %v3179_v56, 16  ;;  %v367_v21 = vshrl.u32 %v3179_v56, 16  ;;  %v373_v22 = vshll.u32 %v3182_v57, 16 }
  0x47   : > { %v649_v14 = vrot.slane %v648_v63, 4  ;;  %v659_v27 = vrot.slane %v658_v7, 4  ;;  %v356_v30 = vrot.slane %v354_v6, 4  ;;  %v359_v31 = vrot.slane %v357_v13, 5  ;;  %v3214_v7 = vld [vmem:[%s2973_s29 + $0x84] sm:$0xf] }
  0x48   : > { %v3196_v25 = vpack.c.b16 %v712_v5, %v711_v60  ;;  %v365_v41 = vrot.slane %v363_v20, 5  ;;  %v369_v42 = vrot.slane %v367_v21, 4  ;;  %v375_v45 = vrot.slane %v373_v22, 5  ;;  %4167 = vst [vmem:[#allocation9_spill] sm:$0xff] %v3214_v7 }
  0x49   : > { %v654_v33 = vsel %vm3000_vm3, %v649_v14, %v653_v54  ;;  %v664_v49 = vsel %vm3000_vm3, %v659_v27, %v663_v0  ;;  %v360_v55 = vor.u32 %v359_v31, %v356_v30  ;;  %v474_v59 = vshrl.u32 %v3194_v26, 16  ;;  %v3221_v30 = vld [vmem:[%s2973_s29 + $0x88] sm:$0xf] }
  0x4a   : > { %2596 = vmatmul.msk.bf16.gmra.mxu2 %vm739_vm4, %v3196_v25  ;;  %v719_v53 = vunpack.c.l.b16 %v654_v33  ;;  %v720_v60 = vunpack.c.l.b16 %v664_v49  ;;  %v370_v63 = vor.u32 %v369_v42, %v365_v41  ;;  %v477_v54 = vshll.u32 %v3194_v26, 16  ;;  %v3226_v49 = vld [vmem:[%s2973_s29 + $0x8c] sm:$0x1] }
  0x4b   : > { %v483_v5 = vshll.u32 %v3199_v32, 16  ;;  %v361_v6 = vrot.slane %v360_v55, 4  ;;  %v476_v13 = vrot.slane %v474_v59, 4  ;;  %v487_v14 = vshrl.u32 %v3199_v32, 16 }
  0x4c   : > { %v493_v0 = vshll.u32 %v3204_v46, 16  ;;  %v3218_v20 = vpack.c.b16 %v720_v60, %v719_v53  ;;  %v371_v21 = vrot.slane %v370_v63, 4  ;;  %v479_v22 = vrot.slane %v477_v54, 5 }
  0x4d   : > { %v485_v27 = vrot.slane %v483_v5, 5  ;;  %v366_v31 = vsel %vm3000_vm3, %v361_v6, %v365_v41  ;;  %v489_v33 = vrot.slane %v487_v14, 4  ;;  %v570_v55 = vshrl.u32 %v3214_v7, 16 }
  0x4e   : > { %4168 = vst [vmem:[#allocation10_spill] sm:$0xff] %v3218_v20  ;;  %v495_v42 = vrot.slane %v493_v0, 5  ;;  %2600 = vmatmul.msk.bf16.gmra.mxu3 %vm739_vm4, %v3218_v20  ;;  %v376_v53 = vsel %vm3000_vm3, %v371_v21, %v375_v45  ;;  %v695_v59 = vunpack.c.l.b16 %v366_v31  ;;  %v480_v60 = vor.u32 %v479_v22, %v476_v13  ;;  %v3243_v22 = vld [vmem:[%s2973_s29 + $0xb8] sm:$0xf] }
  0x4f   : > { %v573_v63 = vshll.u32 %v3214_v7, 16  ;;  %v696_v54 = vunpack.c.l.b16 %v376_v53  ;;  %v490_v41 = vor.u32 %v489_v33, %v485_v27  ;;  %v572_v5 = vrot.slane %v570_v55, 4  ;;  %4170 = vst [vmem:[#allocation12_spill] sm:$0xff] %v3243_v22 }
  0x50   : > { %v579_v6 = vshll.u32 %v3221_v30, 16  ;;  %v481_v14 = vrot.slane %v480_v60, 4  ;;  %v583_v8 = vshrl.u32 %v3221_v30, 16  ;;  %v589_v20 = vshll.u32 %v3226_v49, 16  ;;  %v3248_v60 = vld [vmem:[%s2973_s29 + $0xbc] sm:$0x1] }
  0x51   : > { %v575_v0 = vrot.slane %v573_v63, 5  ;;  %v3240_v45 = vpack.c.b16 %v696_v54, %v695_v59  ;;  %v491_v21 = vrot.slane %v490_v41, 4  ;;  %4171 = vst [vmem:[#allocation13_spill] sm:$0xff] %v3248_v60  ;;  %v666_v54 = vshrl.u32 %v3238_v17, 16 }
  0x52   : > { %v581_v13 = vrot.slane %v579_v6, 5  ;;  %v486_v31 = vsel %vm3000_vm3, %v481_v14, %v485_v27  ;;  %v585_v55 = vrot.slane %v583_v8, 4  ;;  %v591_v53 = vrot.slane %v589_v20, 5 }
  0x53   : > { %v576_v33 = vor.u32 %v575_v0, %v572_v5  ;;  %2588 = vmatmul.msk.bf16.gmra.mxu0 %vm739_vm4, %v3240_v45  ;;  %v496_v59 = vsel %vm3000_vm3, %v491_v21, %v495_v42  ;;  %v705_v63 = vunpack.c.l.b16 %v486_v31  ;;  %v669_v41 = vshll.u32 %v3238_v17, 16 }
  0x54   : > { %v706_v6 = vunpack.c.l.b16 %v496_v59  ;;  %v586_v5 = vor.u32 %v585_v55, %v581_v13  ;;  %v675_v8 = vshll.u32 %v3243_v22, 16  ;;  %v668_v20 = vrot.slane %v666_v54, 4 }
  0x55   : > { %v577_v27 = vrot.slane %v576_v33, 4  ;;  %v671_v14 = vrot.slane %v669_v41, 5  ;;  %v679_v0 = vshrl.u32 %v3243_v22, 16  ;;  %v685_v16 = vshll.u32 %v3248_v60, 16  ;;  %v3267_v33 = vld [vmem:[%s2973_s29 + $0x28] sm:$0xf] }
  0x56   : > { %v3262_v42 = vpack.c.b16 %v706_v6, %v705_v63  ;;  %v587_v31 = vrot.slane %v586_v5, 4  ;;  %v677_v59 = vrot.slane %v675_v8, 5  ;;  %v1125_v55 = vrot.slane %v3020_v2, 5 }
  0x57   : > { %v582_v21 = vsel %vm3000_vm3, %v577_v27, %v581_v13  ;;  %v672_v54 = vor.u32 %v671_v14, %v668_v20  ;;  %v681_v41 = vrot.slane %v679_v0, 4  ;;  %v687_v6 = vrot.slane %v685_v16, 5 }
  0x58   : > { %4172 = vst [vmem:[#allocation14_spill] sm:$0xff] %v3262_v42  ;;  %v713_v17 = vunpack.c.l.b16 %v582_v21  ;;  %2593 = vmatmul.msk.bf16.gmra.mxu1 %vm739_vm4, %v3262_v42  ;;  %v592_v63 = vsel %vm3000_vm3, %v587_v31, %v591_v53  ;;  %v378_v13 = vshrl.u32 %v3260_v40, 16  ;;  %v381_v27 = vshll.u32 %v3260_v40, 16 }
  0x59   : > { %v714_v5 = vunpack.c.l.b16 %v592_v63  ;;  %v673_v8 = vrot.slane %v672_v54, 4  ;;  %v682_v60 = vor.u32 %v681_v41, %v677_v59  ;;  %v387_v2 = vshll.u32 %v3267_v33, 16  ;;  %v2771_v54 = vld [vmem:[%s4115_s1 + $0x18] sm:$0xf]  ;;  %v2792_v41 = vld [vmem:[%s4115_s1 + $0x1c] sm:$0xf] }
  0x5a   : > { %v380_v20 = vrot.slane %v378_v13, 4  ;;  %v383_v14 = vrot.slane %v381_v27, 5  ;;  %v391_v0 = vshrl.u32 %v3267_v33, 16  ;;  %v397_v21 = vshll.u32 %v3271_v39, 16 }
  0x5b   : > { %v3282_v22 = vpack.c.b16 %v714_v5, %v713_v17  ;;  %v678_v16 = vsel %vm3000_vm3, %v673_v8, %v677_v59  ;;  %v683_v53 = vrot.slane %v682_v60, 4  ;;  %v389_v31 = vrot.slane %v387_v2, 5  ;;  %v2754_v17 = vld [vmem:[%s4115_s1 + $0x14] sm:$0xf]  ;;  %v2810_v60 = vld [vmem:[%s4115_s1 + $0x20] sm:$0xf] }
  0x5c   : > { %v721_v63 = vunpack.c.l.b16 %v678_v16  ;;  %v384_v13 = vor.u32 %v383_v14, %v380_v20  ;;  %v393_v27 = vrot.slane %v391_v0, 4  ;;  %v399_v7 = vrot.slane %v397_v21, 5 }
  0x5d   : > { %4173 = vst [vmem:[#allocation15_spill] sm:$0xff] %v3282_v22  ;;  %2597 = vmatmul.msk.bf16.gmra.mxu2 %vm739_vm4, %v3282_v22  ;;  %v688_v59 = vsel %vm3000_vm3, %v683_v53, %v687_v6  ;;  %v2682_v5 = vrot.slane %v3010_v61, 9  ;;  %v1122_v0 = vrot.slane %v3017_v1, 5  ;;  %v1895_v21 = vsel %vm788_vm0, %v2771_v54, 0 }
  0x5e   : > { %v722_v8 = vunpack.c.l.b16 %v688_v59  ;;  %v385_v2 = vrot.slane %v384_v13, 4  ;;  %v394_v20 = vor.u32 %v393_v27, %v389_v31  ;;  %v2051_v16 = vsel %vm788_vm0, %v2792_v41, 0  ;;  %1904 = vmatpush.bf16.msra.mxu2 %v1895_v21  ;;  %v2831_v21 = vld [vmem:[%s2973_s29 + $0xc] sm:$0xff] }
  0x5f   : > { %v1761_v22 = vsel %vm788_vm0, %v2754_v17, 0  ;;  %v2191_v6 = vsel %vm788_vm0, %v2810_v60, 0  ;;  %v1123_v27 = vsel %vm3303_vm7, %v2682_v5, %v1122_v0  ;;  %2060 = vmatpush.bf16.msra.mxu3 %v2051_v16  ;;  %v1124_v54 = vrot.slane %v1122_v0, 4 }
  0x60   : > { %v3312_v53 = vpack.c.b16 %v722_v8, %v721_v63  ;;  %v390_v61 = vsel %vm3000_vm3, %v385_v2, %v389_v31  ;;  %v395_v13 = vrot.slane %v394_v20, 4  ;;  %1770 = vmatpush.bf16.msra.mxu1 %v1761_v22  ;;  %2200 = vmatpush.bf16.msra.mxu0 %v2191_v6  ;;  %v2683_v41 = vrot.slane %v3084_v35, 9  ;;  %v2830_v22 = vld [vmem:[%s2973_s29] sm:$0xff]  ;;  %v3349_v6 = vld [vmem:[%s2973_s29 + $0x18] sm:$0xff] }
  0x61   : > { %v697_v1 = vunpack.c.l.b16 %v390_v61  ;;  %v1234_v31 = vunpack.c.l.b16 %v1123_v27  ;;  %v1129_v17 = vrot.slane %v3091_v43, 5  ;;  %v1132_v60 = vrot.slane %v3094_v48, 5 }
  0x62   : > { %2601 = vmatmul.msk.bf16.gmra.mxu3 %vm739_vm4, %v3312_v53  ;;  %v400_v63 = vsel %vm3000_vm3, %v395_v13, %v399_v7  ;;  %v1126_v5 = vsel %vm3303_vm7, %v1124_v54, %v1125_v55  ;;  %v1136_v16 = vrot.slane %v3179_v56, 5  ;;  %v2684_v61 = vrot.slane %v3174_v52, 9 }
  0x63   : > { %v698_v59 = vunpack.c.l.b16 %v400_v63  ;;  %v1235_v8 = vunpack.c.l.b16 %v1126_v5  ;;  %v1130_v35 = vsel %vm3303_vm7, %v2683_v41, %v1129_v17  ;;  %v1131_v2 = vrot.slane %v1129_v17, 4  ;;  %v3369_v41 = vld [vmem:[%s2973_s29 + $0x24] sm:$0xff] }
  0x64   : > { %v1236_v7 = vunpack.c.l.b16 %v1130_v35  ;;  %v1138_v13 = vrot.slane %v1136_v16, 4  ;;  %v1139_v27 = vrot.slane %v3182_v57, 5  ;;  %v1143_v57 = vrot.slane %v3267_v33, 5 }
  0x65   : > { %v3330_v20 = vpack.c.b16 %v698_v59, %v697_v1  ;;  %v1266_v0 = vpack.c.b16 %v1235_v8, %v1234_v31  ;;  %v1133_v43 = vsel %vm3303_vm7, %v1131_v2, %v1132_v60  ;;  %v2685_v63 = vrot.slane %v3260_v40, 9  ;;  %v3391_v8 = vld [vmem:[%s2973_s29 + $0x30] sm:$0xff] }
  0x66   : > { %v1237_v48 = vunpack.c.l.b16 %v1133_v43  ;;  %v1140_v56 = vsel %vm3303_vm7, %v1138_v13, %v1139_v27  ;;  %v1145_v31 = vrot.slane %v1143_v57, 4  ;;  %v1146_v17 = vrot.slane %v3271_v39, 5  ;;  %v3419_v27 = vld [vmem:[%s2973_s29 + $0x3c] sm:$0xff] }
  0x67   : > { %2589 = vmatmul.msk.bf16.gmra.mxu0 %vm739_vm4, %v3330_v20  ;;  %v1239_v54 = vunpack.c.l.b16 %v1140_v56  ;;  %v1144_v60 = vsel %vm3303_vm7, %v2685_v63, %v1143_v57  ;;  %v1150_v39 = vrot.slane %v2979_v11, 5  ;;  %v2686_v35 = vrot.slane %v2976_v10, 9 }
  0x68   : > { %2666 = vmatmul.msk.bf16.vlgmr.msrb.gmra.mxu1 %vm739_vm4, %v2830_v22  ;;  %v3337_v55 = vpack.c.b16 %v1237_v48, %v1236_v7  ;;  %v1147_v33 = vsel %vm3303_vm7, %v1145_v31, %v1146_v17  ;;  %v1240_v59 = vunpack.c.l.b16 %v1144_v60  ;;  %v1153_v7 = vrot.slane %v2982_v12, 5 }
  0x69   : > { %v1241_v5 = vunpack.c.l.b16 %v1147_v33  ;;  %v1152_v2 = vrot.slane %v1150_v39, 4  ;;  %v1157_v13 = vrot.slane %v3039_v24, 5  ;;  %v2687_v56 = vrot.slane %v3036_v23, 9 }
  0x6b   : > { %v3383_v40 = vpack.c.b16 %v1241_v5, %v1240_v59  ;;  %v1154_v11 = vsel %vm3303_vm7, %v1152_v2, %v1153_v7  ;;  %v1158_v24 = vsel %vm3303_vm7, %v2687_v56, %v1157_v13  ;;  %v1164_v5 = vrot.slane %v3109_v3, 5 }
  0x6c   : > { %v1244_v23 = vunpack.c.l.b16 %v1158_v24  ;;  %v2688_v7 = vrot.slane %v3104_v58, 9  ;;  %v1171_v24 = vrot.slane %v3199_v32, 5 }
  0x6d   : > { %2699 = vmatmul.msk.bf16.vlgmr.msrb.gmra.mxu2 %vm739_vm4, %v1266_v0  ;;  %v1151_v0 = vsel %vm3303_vm7, %v2686_v35, %v1150_v39  ;;  %v3453_v35 = vld [vmem:[%s2973_s29 + $0x48] sm:$0xff] }
  0x6e   : > { %v1242_v48 = vunpack.c.l.b16 %v1151_v0  ;;  %4178 = vst [vmem:[#allocation18_spill] sm:$0xff] %v3453_v35  ;;  %v1166_v0 = vrot.slane %v1164_v5, 4 }
  0x72   : > { %2720 = vmatmul.msk.bf16.vlgmr.msrb.gmra.mxu3 %vm739_vm4, %v2831_v21 }
  0x77   : > { %2737 = vmatmul.msk.bf16.vlgmr.msrb.gmra.mxu0 %vm739_vm4, %v3152_v9  ;;  %v1137_v9 = vsel %vm3303_vm7, %v2684_v61, %v1136_v16 }
  0x78   : > { %2667 = vmatmul.msk.bf16.gmra.mxu1 %vm739_vm4, %v2831_v21  ;;  %v1238_v1 = vunpack.c.l.b16 %v1137_v9  ;;  %v1243_v21 = vunpack.c.l.b16 %v1154_v11  ;;  %v1167_v11 = vrot.slane %v3116_v15, 5 }
  0x7a   : > { %v3363_v52 = vpack.c.b16 %v1239_v54, %v1238_v1  ;;  %v3411_v12 = vpack.c.b16 %v1243_v21, %v1242_v48  ;;  %v1159_v1 = vrot.slane %v1157_v13, 4  ;;  %v1160_v54 = vrot.slane %v3044_v29, 5 }
  0x7b   : > { %v1165_v21 = vsel %vm3303_vm7, %v2688_v7, %v1164_v5  ;;  %v1168_v13 = vsel %vm3303_vm7, %v1166_v0, %v1167_v11  ;;  %v2689_v5 = vrot.slane %v3194_v26, 9  ;;  %v1173_v7 = vrot.slane %v1171_v24, 4 }
  0x7c   : > { %v1161_v63 = vsel %vm3303_vm7, %v1159_v1, %v1160_v54  ;;  %v1246_v56 = vunpack.c.l.b16 %v1165_v21  ;;  %v1247_v1 = vunpack.c.l.b16 %v1168_v13  ;;  %v1174_v0 = vrot.slane %v3204_v46, 5 }
  0x7d   : > { %2700 = vmatmul.msk.bf16.gmra.mxu2 %vm739_vm4, %v3337_v55  ;;  %v1245_v60 = vunpack.c.l.b16 %v1161_v63  ;;  %v1172_v32 = vsel %vm3303_vm7, %v2689_v5, %v1171_v24  ;;  %v1178_v5 = vrot.slane %v2991_v19, 5 }
  0x7e   : > { %v3477_v54 = vpack.c.b16 %v1247_v1, %v1246_v56  ;;  %v1175_v13 = vsel %vm3303_vm7, %v1173_v7, %v1174_v0  ;;  %v1248_v56 = vunpack.c.l.b16 %v1172_v32  ;;  %v2877_v32 = vld [vmem:[%s2973_s29 + $0x68] sm:$0x1] }
  0x7f   : > { %v3443_v33 = vpack.c.b16 %v1245_v60, %v1244_v23  ;;  %v3487_v60 = vld [vmem:[%s2973_s29 + $0x54] sm:$0xff]  ;;  %v1249_v46 = vunpack.c.l.b16 %v1175_v13  ;;  %v1181_v13 = vrot.slane %v2877_v32, 5 }
  0x80   : > { %4181 = vst [vmem:[#allocation21_spill] sm:$0xff] %v3477_v54 }
  0x81   : > { %4182 = vst [vmem:[#allocation22_spill] sm:$0xff] %v3487_v60 }
  0x82   : > { %2721 = vmatmul.msk.bf16.gmra.mxu3 %vm739_vm4, %v3349_v6 }
  0x87   : > { %2738 = vmatmul.msk.bf16.gmra.mxu0 %vm739_vm4, %v3240_v45 }
  0x88   : > { %2668 = vmatmul.msk.bf16.gmra.mxu1 %vm739_vm4, %v3349_v6 }
  0x8d   : > { %2701 = vmatmul.msk.bf16.gmra.mxu2 %vm739_vm4, %v3363_v52 }
  0x92   : > { %2722 = vmatmul.msk.bf16.gmra.mxu3 %vm739_vm4, %v3369_v41 }
  0x97   : > { %2739 = vmatmul.msk.bf16.gmra.mxu0 %vm739_vm4, %v3330_v20 }
  0x98   : > { %2669 = vmatmul.msk.bf16.gmra.mxu1 %vm739_vm4, %v3369_v41 }
  0x9d   : > { %v3386_v22 = vpop.f32.mrf.mxu1  ;;  %2702 = vmatmul.msk.bf16.gmra.mxu2 %vm739_vm4, %v3383_v40 }
  0xa2   : > { %2723 = vmatmul.msk.bf16.gmra.mxu3 %vm739_vm4, %v3391_v8 }
  0xa5   : > { %v3401_v43 = vpop.f32.mrf.mxu1 }
  0xa7   : > { %v3403_v16 = vpop.f32.mrf.mxu2  ;;  %2740 = vmatmul.msk.bf16.gmra.mxu0 %vm739_vm4, %v3012_v62 }
  0xa8   : > { %2670 = vmatmul.msk.bf16.gmra.mxu1 %vm739_vm4, %v3391_v8 }
  0xaa   : > { %v3409_v10 = vpop.f32.mrf.mxu0 }
  0xab   : > { %v3413_v61 = vpop.f32.mrf.mxu3 }
  0xac   : > { %4176 = vst [vmem:[#allocation16_spill] sm:$0xff] %v3413_v61 }
  0xad   : > { %2703 = vmatmul.msk.bf16.gmra.mxu2 %vm739_vm4, %v3411_v12 }
  0xaf   : > { %v3421_v9 = vpop.f32.mrf.mxu1  ;;  %v3425_v57 = vpop.f32.mrf.mxu2 }
  0xb2   : > { %2724 = vmatmul.msk.bf16.gmra.mxu3 %vm739_vm4, %v3419_v27  ;;  %v3433_v31 = vpop.f32.mrf.mxu0 }
  0xb3   : > { %v3435_v17 = vpop.f32.mrf.mxu3 }
  0xb4   : > { %4177 = vst [vmem:[#allocation17_spill] sm:$0xff] %v3435_v17 }
  0xb7   : > { %2741 = vmatmul.msk.bf16.gmra.mxu0 %vm739_vm4, %v3086_v37  ;;  %v3439_v29 = vpop.f32.mrf.mxu1 }
  0xb8   : > { %2671 = vmatmul.msk.bf16.gmra.mxu1 %vm739_vm4, %v3419_v27 }
  0xba   : > { %v3445_v59 = vpop.f32.mrf.mxu2 }
  0xbd   : > { %2704 = vmatmul.msk.bf16.gmra.mxu2 %vm739_vm4, %v3443_v33 }
  0xbe   : > { %v3448_v39 = vpop.f32.mrf.mxu0 }
  0xbf   : > { %v3455_v2 = vpop.f32.mrf.mxu3 }
  0xc0   : > { %4179 = vst [vmem:[#allocation19_spill] sm:$0xff] %v3455_v2 }
  0xc1   : > { %v3459_v48 = vpop.f32.mrf.mxu1 }
  0xc2   : > { %2725 = vmatmul.msk.bf16.gmra.mxu3 %vm739_vm4, %v3453_v35  ;;  %v3463_v3 = vpop.f32.mrf.mxu2 }
  0xc6   : > { %v3469_v58 = vpop.f32.mrf.mxu0 }
  0xc7   : > { %2742 = vmatmul.msk.bf16.gmra.mxu0 %vm739_vm4, %v3171_v44  ;;  %v3473_v15 = vpop.f32.mrf.mxu3 }
  0xc8   : > { %4180 = vst [vmem:[#allocation20_spill] sm:$0xff] %v3473_v15  ;;  %2672 = vmatmul.msk.bf16.gmra.mxu1 %vm739_vm4, %v3453_v35  ;;  %v3522_v15 = vld [vmem:[%s2973_s29 + $0x60] sm:$0xff] }
  0xc9   : > { %v3480_v63 = vpop.f32.mrf.mxu1  ;;  %4186 = vst [vmem:[#allocation26_spill] sm:$0xff] %v3522_v15 }
  0xcd   : > { %v3482_v23 = vpop.f32.mrf.mxu2  ;;  %2705 = vmatmul.msk.bf16.gmra.mxu2 %vm739_vm4, %v3477_v54 }
  0xd0   : > { %v3491_v11 = vpop.f32.mrf.mxu0 }
  0xd1   : > { %v3493_v21 = vpop.f32.mrf.mxu3 }
  0xd2   : > { %4183 = vst [vmem:[#allocation23_spill] sm:$0xff] %v3493_v21  ;;  %2726 = vmatmul.msk.bf16.gmra.mxu3 %vm739_vm4, %v3487_v60  ;;  %v3509_v21 = vpack.c.b16 %v1249_v46, %v1248_v56 }
  0xd4   : > { %4184 = vst [vmem:[#allocation24_spill] sm:$0xff] %v3509_v21 }
  0xd5   : > { %v3501_v26 = vpop.f32.mrf.mxu1  ;;  %v3503_v1 = vpop.f32.mrf.mxu2 }
  0xd7   : > { %2743 = vmatmul.msk.bf16.gmra.mxu0 %vm739_vm4, %v3262_v42  ;;  %v2878_v42 = vld [vmem:[%s2973_s29 + $0x60] sm:$0xf] }
  0xd8   : > { %2673 = vmatmul.msk.bf16.gmra.mxu1 %vm739_vm4, %v3487_v60  ;;  %v3511_v24 = vpop.f32.mrf.mxu0  ;;  %v2690_v2 = vrot.slane %v2878_v42, 9  ;;  %v1180_v60 = vrot.slane %v1178_v5, 4 }
  0xd9   : > { %v3514_v7 = vpop.f32.mrf.mxu3 }
  0xda   : > { %4185 = vst [vmem:[#allocation25_spill] sm:$0xff] %v3514_v7  ;;  %v1179_v19 = vsel %vm3303_vm7, %v2690_v2, %v1178_v5  ;;  %v1182_v46 = vsel %vm3303_vm7, %v1180_v60, %v1181_v13  ;;  %v1185_v60 = vrot.slane %v3059_v47, 5 }
  0xdb   : > { %v1250_v17 = vunpack.c.l.b16 %v1179_v19  ;;  %v1251_v42 = vunpack.c.l.b16 %v1182_v46  ;;  %v3555_v19 = vld [vmem:[%s2973_s29 + $0x6c] sm:$0xff] }
  0xdd   : > { %2706 = vmatmul.msk.bf16.gmra.mxu2 %vm739_vm4, %v3509_v21  ;;  %v3518_v0 = vpop.f32.mrf.mxu1  ;;  %v3544_v2 = vpack.c.b16 %v1251_v42, %v1250_v17  ;;  %v1187_v17 = vrot.slane %v1185_v60, 4 }
  0xdf   : > { %4188 = vst [vmem:[#allocation28_spill] sm:$0xff] %v3544_v2 }
  0xe0   : > { %v3525_v56 = vpop.f32.mrf.mxu2 }
  0xe2   : > { %2727 = vmatmul.msk.bf16.gmra.mxu3 %vm739_vm4, %v3522_v15 }
  0xe4   : > { %v3533_v7 = vpop.f32.mrf.mxu0 }
  0xe5   : > { %v3535_v32 = vpop.f32.mrf.mxu3  ;;  %v1021_v21 = vpop.f32.mrf.mxu1 }
  0xe6   : > { %4187 = vst [vmem:[#allocation27_spill] sm:$0xff] %v3535_v32  ;;  %v1022_v54 = vadd.f32 %v1021_v21, %v3409_v10  ;;  %v1188_v21 = vrot.slane %v3066_v51, 5  ;;  %v2691_v32 = vrot.slane %v3052_v38, 9 }
  0xe7   : > { %2744 = vmatmul.msk.bf16.gmra.mxu0 %vm739_vm4, %v3031_v18 }
  0xe8   : > { %v3540_v44 = vpop.f32.mrf.mxu2  ;;  %2674 = vmatmul.msk.bf16.gmra.mxu1 %vm739_vm4, %v3522_v15  ;;  %v1186_v47 = vsel %vm3303_vm7, %v2691_v32, %v1185_v60 }
  0xe9   : > { %v1252_v61 = vunpack.c.l.b16 %v1186_v47 }
  0xec   : > { %v3547_v5 = vpop.f32.mrf.mxu0 }
  0xed   : > { %v3549_v13 = vpop.f32.mrf.mxu3  ;;  %2707 = vmatmul.msk.bf16.gmra.mxu2 %vm739_vm4, %v3544_v2  ;;  %v1023_v10 = vpop.f32.mrf.mxu1 }
  0xee   : > { %4189 = vst [vmem:[#allocation29_spill] sm:$0xff] %v3549_v13  ;;  %v1024_v46 = vadd.f32 %v1023_v10, %v3433_v31  ;;  %v1189_v13 = vsel %vm3303_vm7, %v1187_v17, %v1188_v21  ;;  %v1192_v21 = vrot.slane %v3131_v34, 5 }
  0xef   : > { %v1253_v35 = vunpack.c.l.b16 %v1189_v13  ;;  %v1195_v13 = vrot.slane %v3138_v50, 5 }
  0xf0   : > { %v1342_v42 = vpop.f32.mrf.mxu2 }
  0xf1   : > { %v1422_v18 = vadd.f32 %v1342_v42, %v1022_v54  ;;  %v3572_v10 = vpack.c.b16 %v1253_v35, %v1252_v61  ;;  %v3579_v42 = vld [vmem:[%s2973_s29 + $0x78] sm:$0xff] }
  0xf2   : > { %2728 = vmatmul.msk.bf16.gmra.mxu3 %vm739_vm4, %v3555_v19 }
  0xf4   : > { %v1632_v2 = vpop.f32.mrf.mxu0 }
  0xf5   : > { %v1476_v51 = vpop.f32.mrf.mxu3  ;;  %v1026_v15 = vpop.f32.mrf.mxu1 }
  0xf6   : > { %v1556_v31 = vadd.f32 %v1476_v51, %v1422_v18  ;;  %v1027_v38 = vadd.f32 %v1026_v15, %v3448_v39 }
  0xf7   : > { %2745 = vmatmul.msk.bf16.gmra.mxu0 %vm739_vm4, %v3111_v4 }
  0xf8   : > { %v1344_v54 = vpop.f32.mrf.mxu2  ;;  %2675 = vmatmul.msk.bf16.gmra.mxu1 %vm739_vm4, %v3555_v19  ;;  %v3570_v32 = vadd.f32 %v1632_v2, %v1556_v31  ;;  %v2692_v2 = vrot.slane %v3127_v28, 9 }
  0xf9   : > { %v1423_v60 = vadd.f32 %v1344_v54, %v1024_v46  ;;  %v1194_v46 = vrot.slane %v1192_v21, 4 }
  0xfa   : > { %v1193_v50 = vsel %vm3303_vm7, %v2692_v2, %v1192_v21 }
  0xfb   : > { %v1196_v51 = vsel %vm3303_vm7, %v1194_v46, %v1195_v13  ;;  %v1202_v46 = vrot.slane %v3226_v49, 5 }
  0xfc   : > { %v1634_v17 = vpop.f32.mrf.mxu0 }
  0xfd   : > { %v1478_v18 = vpop.f32.mrf.mxu3  ;;  %2708 = vmatmul.msk.bf16.gmra.mxu2 %vm739_vm4, %v3572_v10  ;;  %v1028_v39 = vpop.f32.mrf.mxu1 }
  0xfe   : > { %v1557_v15 = vadd.f32 %v1478_v18, %v1423_v60  ;;  %v1029_v47 = vadd.f32 %v1028_v39, %v3469_v58  ;;  %v1254_v58 = vunpack.c.l.b16 %v1193_v50  ;;  %v1255_v18 = vunpack.c.l.b16 %v1196_v51  ;;  %v3605_v50 = vld [vmem:[%s2973_s29 + $0x84] sm:$0xff] }
 0x100   : > { %v1347_v61 = vpop.f32.mrf.mxu2  ;;  %v3583_v35 = vadd.f32 %v1634_v17, %v1557_v15  ;;  %v3598_v13 = vpack.c.b16 %v1255_v18, %v1254_v58  ;;  %v1199_v15 = vrot.slane %v3221_v30, 5 }
 0x101   : > { %v1424_v34 = vadd.f32 %v1347_v61, %v1027_v38 }
 0x102   : > { %2729 = vmatmul.msk.bf16.gmra.mxu3 %vm739_vm4, %v3579_v42 }
 0x104   : > { %v1637_v31 = vpop.f32.mrf.mxu0 }
 0x105   : > { %v1481_v54 = vpop.f32.mrf.mxu3  ;;  %v1031_v60 = vpop.f32.mrf.mxu1 }
 0x106   : > { %v1558_v28 = vadd.f32 %v1481_v54, %v1424_v34  ;;  %v1032_v17 = vadd.f32 %v1031_v60, %v3491_v11 }
 0x107   : > { %2746 = vmatmul.msk.bf16.gmra.mxu0 %vm739_vm4, %v3196_v25 }
 0x108   : > { %v1349_v38 = vpop.f32.mrf.mxu2  ;;  %2676 = vmatmul.msk.bf16.gmra.mxu1 %vm739_vm4, %v3579_v42  ;;  %v3596_v21 = vadd.f32 %v1637_v31, %v1558_v28  ;;  %v4190_v31 = vld [vmem:[#allocation9_spill] sm:$0xff] }
 0x109   : > { %v1425_v39 = vadd.f32 %v1349_v38, %v1029_v47  ;;  %v2693_v54 = vrot.slane %v4190_v31, 9  ;;  %v1201_v47 = vrot.slane %v1199_v15, 4 }
 0x10b   : > { %v1200_v49 = vsel %vm3303_vm7, %v2693_v54, %v1199_v15  ;;  %v1203_v18 = vsel %vm3303_vm7, %v1201_v47, %v1202_v46  ;;  %v2879_v54 = vld [vmem:[%s2973_s29 + $0x94] sm:$0xf] }
 0x10c   : > { %v1639_v2 = vpop.f32.mrf.mxu0  ;;  %v1206_v47 = vrot.slane %v2879_v54, 5 }
 0x10d   : > { %v1483_v61 = vpop.f32.mrf.mxu3  ;;  %2709 = vmatmul.msk.bf16.gmra.mxu2 %vm739_vm4, %v3598_v13  ;;  %v1033_v11 = vpop.f32.mrf.mxu1 }
 0x10e   : > { %v1559_v34 = vadd.f32 %v1483_v61, %v1425_v39  ;;  %v1034_v51 = vadd.f32 %v1033_v11, %v3511_v24  ;;  %v1256_v39 = vunpack.c.l.b16 %v1200_v49  ;;  %v1257_v61 = vunpack.c.l.b16 %v1203_v18 }
 0x110   : > { %v1352_v60 = vpop.f32.mrf.mxu2  ;;  %v3609_v58 = vadd.f32 %v1639_v2, %v1559_v34  ;;  %v3624_v31 = vpack.c.b16 %v1257_v61, %v1256_v39 }
 0x111   : > { %v1426_v30 = vadd.f32 %v1352_v60, %v1032_v17  ;;  %v4192_v17 = vld [vmem:[#allocation15_spill] sm:$0xff] }
 0x112   : > { %4191 = vst [vmem:[#allocation9_spill] sm:$0xff] %v3609_v58  ;;  %2730 = vmatmul.msk.bf16.gmra.mxu3 %vm739_vm4, %v3605_v50 }
 0x113   : > { %4194 = vst [vmem:[#allocation31_spill] sm:$0xff] %v3624_v31 }
 0x114   : > { %v1642_v28 = vpop.f32.mrf.mxu0 }
 0x115   : > { %v1486_v24 = vpop.f32.mrf.mxu3  ;;  %v1036_v38 = vpop.f32.mrf.mxu1 }
 0x116   : > { %v1560_v11 = vadd.f32 %v1486_v24, %v1426_v30  ;;  %v1037_v2 = vadd.f32 %v1036_v38, %v3533_v7  ;;  %v2880_v30 = vld [vmem:[%s2973_s29 + $0x98] sm:$0x1]  ;;  %v3631_v38 = vld [vmem:[%s2973_s29 + $0x90] sm:$0xff] }
 0x117   : > { %2747 = vmatmul.msk.bf16.gmra.mxu0 %vm739_vm4, %v4192_v17  ;;  %v1209_v49 = vrot.slane %v2880_v30, 5  ;;  %4195 = vst [vmem:[#allocation32_spill] sm:$0xff] %v3631_v38 }
 0x118   : > { %v1354_v34 = vpop.f32.mrf.mxu2  ;;  %2677 = vmatmul.msk.bf16.gmra.mxu1 %vm739_vm4, %v3605_v50  ;;  %v3622_v15 = vadd.f32 %v1642_v28, %v1560_v11  ;;  %v2881_v28 = vld [vmem:[%s2973_s29 + $0x90] sm:$0xf] }
 0x119   : > { %v1427_v46 = vadd.f32 %v1354_v34, %v1034_v51  ;;  %v2694_v11 = vrot.slane %v2881_v28, 9  ;;  %v1208_v51 = vrot.slane %v1206_v47, 4 }
 0x11a   : > { %4193 = vst [vmem:[#allocation30_spill] sm:$0xff] %v3622_v15 }
 0x11b   : > { %v1207_v54 = vsel %vm3303_vm7, %v2694_v11, %v1206_v47  ;;  %v2882_v11 = vld [vmem:[%s2973_s29 + $0xa0] sm:$0xf] }
 0x11c   : > { %v1644_v60 = vpop.f32.mrf.mxu0 }
 0x11d   : > { %v1488_v7 = vpop.f32.mrf.mxu3  ;;  %2710 = vmatmul.msk.bf16.gmra.mxu2 %vm739_vm4, %v3624_v31  ;;  %v1038_v18 = vpop.f32.mrf.mxu1  ;;  %v2884_v31 = vld [vmem:[%s2973_s29 + $0x9c] sm:$0xf] }
 0x11e   : > { %v1561_v24 = vadd.f32 %v1488_v7, %v1427_v46  ;;  %v1039_v58 = vadd.f32 %v1038_v18, %v3547_v5  ;;  %v1210_v46 = vsel %vm3303_vm7, %v1208_v51, %v1209_v49  ;;  %v1258_v18 = vunpack.c.l.b16 %v1207_v54 }
 0x11f   : > { %v1259_v28 = vunpack.c.l.b16 %v1210_v46  ;;  %v1213_v51 = vrot.slane %v2882_v11, 5  ;;  %v2883_v46 = vld [vmem:[%s2973_s29 + $0xa4] sm:$0x1] }
 0x120   : > { %v1357_v39 = vpop.f32.mrf.mxu2  ;;  %v3635_v61 = vadd.f32 %v1644_v60, %v1561_v24  ;;  %v4197_v60 = vld [vmem:[#allocation3_spill] sm:$0xff] }
 0x121   : > { %v1428_v34 = vadd.f32 %v1357_v39, %v1037_v2  ;;  %v3649_v49 = vpack.c.b16 %v1259_v28, %v1258_v18 }
 0x122   : > { %4196 = vst [vmem:[#allocation33_spill] sm:$0xff] %v3635_v61  ;;  %2731 = vmatmul.msk.bf16.gmra.mxu3 %vm739_vm4, %v3631_v38 }
 0x123   : > { %4199 = vst [vmem:[#allocation35_spill] sm:$0xff] %v3649_v49 }
 0x124   : > { %v1647_v30 = vpop.f32.mrf.mxu0 }
 0x125   : > { %v1491_v7 = vpop.f32.mrf.mxu3  ;;  %v1041_v5 = vpop.f32.mrf.mxu1 }
 0x126   : > { %v1562_v15 = vadd.f32 %v1491_v7, %v1428_v34  ;;  %v1216_v7 = vrot.slane %v2883_v46, 5 }
 0x127   : > { %2748 = vmatmul.msk.bf16.gmra.mxu0 %vm739_vm4, %v4197_v60  ;;  %v3656_v60 = vld [vmem:[%s2973_s29 + $0x9c] sm:$0xff] }
 0x128   : > { %v1359_v2 = vpop.f32.mrf.mxu2  ;;  %2678 = vmatmul.msk.bf16.gmra.mxu1 %vm739_vm4, %v3631_v38  ;;  %v3647_v47 = vadd.f32 %v1647_v30, %v1562_v15  ;;  %4200 = vst [vmem:[#allocation36_spill] sm:$0xff] %v3656_v60  ;;  %v2695_v38 = vrot.slane %v2884_v31, 9  ;;  %v1215_v15 = vrot.slane %v1213_v51, 4 }
 0x129   : > { %v1429_v24 = vadd.f32 %v1359_v2, %v1039_v58  ;;  %v1042_v58 = vadd.f32 %v1041_v5, %v3386_v22  ;;  %v4202_v5 = vld [vmem:[#allocation4_spill] sm:$0xff] }
 0x12a   : > { %4198 = vst [vmem:[#allocation34_spill] sm:$0xff] %v3647_v47  ;;  %v1214_v2 = vsel %vm3303_vm7, %v2695_v38, %v1213_v51 }
 0x12b   : > { %v1260_v31 = vunpack.c.l.b16 %v1214_v2 }
 0x12c   : > { %v1649_v39 = vpop.f32.mrf.mxu0 }
 0x12d   : > { %v1493_v54 = vpop.f32.mrf.mxu3  ;;  %2711 = vmatmul.msk.bf16.gmra.mxu2 %vm739_vm4, %v3649_v49  ;;  %v1043_v34 = vpop.f32.mrf.mxu1 }
 0x12e   : > { %v1563_v61 = vadd.f32 %v1493_v54, %v1429_v24  ;;  %v1217_v24 = vsel %vm3303_vm7, %v1215_v15, %v1216_v7  ;;  %v4205_v15 = vld [vmem:[#allocation6_spill] sm:$0xff] }
 0x12f   : > { %v1261_v47 = vunpack.c.l.b16 %v1217_v24  ;;  %v4206_v24 = vld [vmem:[#allocation7_spill] sm:$0xff] }
 0x130   : > { %v1362_v30 = vpop.f32.mrf.mxu2  ;;  %v3660_v18 = vadd.f32 %v1649_v39, %v1563_v61  ;;  %v1044_v61 = vadd.f32 %v1043_v34, %v3401_v43  ;;  %v3682_v34 = vld [vmem:[%s2973_s29 + $0xa8] sm:$0xff] }
 0x131   : > { %v1430_v28 = vadd.f32 %v1362_v30, %v1042_v58  ;;  %v3675_v7 = vpack.c.b16 %v1261_v47, %v1260_v31  ;;  %v1220_v58 = vrot.slane %v4205_v15, 5  ;;  %4207 = vst [vmem:[#allocation6_spill] sm:$0xff] %v3682_v34 }
 0x132   : > { %4201 = vst [vmem:[#allocation37_spill] sm:$0xff] %v3660_v18  ;;  %2732 = vmatmul.msk.bf16.gmra.mxu3 %vm739_vm4, %v3656_v60  ;;  %v4208_v18 = vld [vmem:[#allocation5_spill] sm:$0xff] }
 0x133   : > { %4204 = vst [vmem:[#allocation39_spill] sm:$0xff] %v3675_v7 }
 0x134   : > { %v1652_v11 = vpop.f32.mrf.mxu0 }
 0x135   : > { %v1496_v54 = vpop.f32.mrf.mxu3  ;;  %v1046_v46 = vpop.f32.mrf.mxu1 }
 0x136   : > { %v1564_v22 = vadd.f32 %v1496_v54, %v1430_v28  ;;  %v1223_v54 = vrot.slane %v4206_v24, 5 }
 0x137   : > { %2749 = vmatmul.msk.bf16.gmra.mxu0 %vm739_vm4, %v4202_v5  ;;  %v2696_v5 = vrot.slane %v4208_v18, 9 }
 0x138   : > { %v1364_v39 = vpop.f32.mrf.mxu2  ;;  %2679 = vmatmul.msk.bf16.gmra.mxu1 %vm739_vm4, %v3656_v60  ;;  %v3673_v38 = vadd.f32 %v1652_v11, %v1564_v22  ;;  %v1222_v11 = vrot.slane %v1220_v58, 4  ;;  %v1047_v22 = vadd.f32 %v1046_v46, %v3421_v9 }
 0x139   : > { %v1431_v51 = vadd.f32 %v1364_v39, %v1044_v61  ;;  %v1221_v39 = vsel %vm3303_vm7, %v2696_v5, %v1220_v58  ;;  %v3700_v5 = vld [vmem:[%s2973_s29 + $0xc0] sm:$0xf] }
 0x13a   : > { %4203 = vst [vmem:[#allocation38_spill] sm:$0xff] %v3673_v38  ;;  %v1262_v24 = vunpack.c.l.b16 %v1221_v39  ;;  %v4210_v38 = vld [vmem:[#allocation10_spill] sm:$0xff]  ;;  %v1589_v39 = vshrl.u32 %v3700_v5, 16 }
 0x13b   : > { %4211 = vst [vmem:[#allocation5_spill] sm:$0xff] %v3700_v5 }
 0x13c   : > { %v1654_v30 = vpop.f32.mrf.mxu0 }
 0x13d   : > { %v1498_v2 = vpop.f32.mrf.mxu3  ;;  %2712 = vmatmul.msk.bf16.gmra.mxu2 %vm739_vm4, %v3675_v7  ;;  %v1048_v28 = vpop.f32.mrf.mxu1 }
 0x13e   : > { %v1565_v43 = vadd.f32 %v1498_v2, %v1431_v51  ;;  %v1224_v51 = vsel %vm3303_vm7, %v1222_v11, %v1223_v54 }
 0x13f   : > { %v1263_v9 = vunpack.c.l.b16 %v1224_v51 }
 0x140   : > { %v1367_v47 = vpop.f32.mrf.mxu2  ;;  %v3686_v31 = vadd.f32 %v1654_v30, %v1565_v43  ;;  %v1049_v30 = vadd.f32 %v1048_v28, %v3439_v29  ;;  %v1592_v29 = vshll.u32 %v3700_v5, 16 }
 0x141   : > { %v1432_v61 = vadd.f32 %v1367_v47, %v1047_v22  ;;  %v3704_v11 = vpack.c.b16 %v1263_v9, %v1262_v24  ;;  %v3707_v22 = vld [vmem:[%s2973_s29 + $0xc4] sm:$0xf]  ;;  %v4215_v47 = vld [vmem:[#allocation12_spill] sm:$0xff]  ;;  %v4216_v24 = vld [vmem:[#allocation13_spill] sm:$0xff] }
 0x142   : > { %4209 = vst [vmem:[#allocation7_spill] sm:$0xff] %v3686_v31  ;;  %2733 = vmatmul.msk.bf16.gmra.mxu3 %vm739_vm4, %v3682_v34  ;;  %v1598_v28 = vshll.u32 %v3707_v22, 16  ;;  %v1230_v9 = vrot.slane %v4216_v24, 5  ;;  %v1594_v7 = vrot.slane %v1592_v29, 5 }
 0x143   : > { %4213 = vst [vmem:[#allocation41_spill] sm:$0xff] %v3704_v11 }
 0x144   : > { %v1657_v15 = vpop.f32.mrf.mxu0  ;;  %4214 = vst [vmem:[#allocation42_spill] sm:$0xff] %v3707_v22 }
 0x145   : > { %v1501_v18 = vpop.f32.mrf.mxu3  ;;  %v1051_v2 = vpop.f32.mrf.mxu1 }
 0x146   : > { %v1566_v46 = vadd.f32 %v1501_v18, %v1432_v61  ;;  %v1227_v61 = vrot.slane %v4215_v47, 5  ;;  %v1602_v18 = vshrl.u32 %v3707_v22, 16  ;;  %v1052_v5 = vadd.f32 %v1051_v2, %v3459_v48 }
 0x147   : > { %2750 = vmatmul.msk.bf16.gmra.mxu0 %vm739_vm4, %v4210_v38  ;;  %v1591_v38 = vrot.slane %v1589_v39, 4  ;;  %v1600_v22 = vrot.slane %v1598_v28, 5 }
 0x148   : > { %v1369_v43 = vpop.f32.mrf.mxu2  ;;  %2680 = vmatmul.msk.bf16.gmra.mxu1 %vm739_vm4, %v3682_v34  ;;  %v3702_v58 = vadd.f32 %v1657_v15, %v1566_v46  ;;  %v1604_v60 = vrot.slane %v1602_v18, 4 }
 0x149   : > { %v1433_v54 = vadd.f32 %v1369_v43, %v1049_v30  ;;  %v3718_v30 = vld [vmem:[%s2973_s29 + $0xb4] sm:$0xff]  ;;  %v4217_v43 = vld [vmem:[#allocation11_spill] sm:$0xff]  ;;  %v1595_v2 = vor.u32 %v1594_v7, %v1591_v38 }
 0x14a   : > { %4212 = vst [vmem:[#allocation40_spill] sm:$0xff] %v3702_v58  ;;  %v2697_v47 = vrot.slane %v4217_v43, 9  ;;  %v1229_v58 = vrot.slane %v1227_v61, 4  ;;  %v1605_v39 = vor.u32 %v1604_v60, %v1600_v22 }
 0x14c   : > { %v1659_v51 = vpop.f32.mrf.mxu0  ;;  %v1606_v38 = vrot.slane %v1605_v39, 4 }
 0x14d   : > { %v1503_v31 = vpop.f32.mrf.mxu3  ;;  %2713 = vmatmul.msk.bf16.gmra.mxu2 %vm739_vm4, %v3704_v11  ;;  %v1053_v15 = vpop.f32.mrf.mxu1  ;;  %v3725_v11 = vld [vmem:[%s2973_s29 + $0xc8] sm:$0x1] }
 0x14e   : > { %v1567_v46 = vadd.f32 %v1503_v31, %v1433_v54  ;;  %v1228_v31 = vsel %vm3303_vm7, %v2697_v47, %v1227_v61  ;;  %v1231_v54 = vsel %vm3303_vm7, %v1229_v58, %v1230_v9  ;;  %v1608_v29 = vshll.u32 %v3725_v11, 16 }
 0x14f   : > { %v1264_v18 = vunpack.c.l.b16 %v1228_v31  ;;  %v1054_v24 = vadd.f32 %v1053_v15, %v3480_v63  ;;  %v1596_v58 = vrot.slane %v1595_v2, 4 }
 0x150   : > { %v1372_v34 = vpop.f32.mrf.mxu2  ;;  %v3722_v49 = vadd.f32 %v1659_v51, %v1567_v46  ;;  %v1610_v60 = vrot.slane %v1608_v29, 5 }
 0x151   : > { %v1434_v17 = vadd.f32 %v1372_v34, %v1052_v5  ;;  %v1265_v34 = vunpack.c.l.b16 %v1231_v54  ;;  %v3750_v54 = vld [vmem:[%s2973_s29 + $0xc0] sm:$0xff] }
 0x152   : > { %2734 = vmatmul.msk.bf16.gmra.mxu3 %vm739_vm4, %v3718_v30  ;;  %v1611_v63 = vsel %vm3000_vm3, %v1606_v38, %v1610_v60 }
 0x153   : > { %v3741_v46 = vpack.c.b16 %v1265_v34, %v1264_v18  ;;  %v1615_v39 = vunpack.c.l.b16 %v1611_v63 }
 0x154   : > { %v1662_v48 = vpop.f32.mrf.mxu0 }
 0x155   : > { %v1506_v28 = vpop.f32.mrf.mxu3  ;;  %v1056_v51 = vpop.f32.mrf.mxu1 }
 0x156   : > { %v1568_v5 = vadd.f32 %v1506_v28, %v1434_v17  ;;  %v1601_v17 = vsel %vm3000_vm3, %v1596_v58, %v1600_v22 }
 0x157   : > { %2751 = vmatmul.msk.bf16.gmra.mxu0 %vm739_vm4, %v3312_v53  ;;  %v1614_v2 = vunpack.c.l.b16 %v1601_v17 }
 0x158   : > { %v1374_v61 = vpop.f32.mrf.mxu2  ;;  %2681 = vmatmul.msk.bf16.gmra.mxu1 %vm739_vm4, %v3718_v30  ;;  %v3739_v7 = vadd.f32 %v1662_v48, %v1568_v5  ;;  %v1057_v48 = vadd.f32 %v1056_v51, %v3501_v26 }
 0x159   : > { %v1435_v9 = vadd.f32 %v1374_v61, %v1054_v24  ;;  %v3757_v22 = vpack.c.b16 %v1615_v39, %v1614_v2 }
 0x15c   : > { %v1664_v43 = vpop.f32.mrf.mxu0 }
 0x15d   : > { %v1508_v15 = vpop.f32.mrf.mxu3  ;;  %2714 = vmatmul.msk.bf16.gmra.mxu2 %vm739_vm4, %v3741_v46  ;;  %v1058_v47 = vpop.f32.mrf.mxu1 }
 0x15e   : > { %v1569_v31 = vadd.f32 %v1508_v15, %v1435_v9  ;;  %v1059_v26 = vadd.f32 %v1058_v47, %v3518_v0 }
 0x160   : > { %v1377_v29 = vpop.f32.mrf.mxu2  ;;  %v3753_v28 = vadd.f32 %v1664_v43, %v1569_v31 }
 0x161   : > { %v1436_v18 = vadd.f32 %v1377_v29, %v1057_v48 }
 0x162   : > { %2735 = vmatmul.msk.bf16.gmra.mxu3 %vm739_vm4, %v3750_v54 }
 0x164   : > { %v1667_v34 = vpop.f32.mrf.mxu0 }
 0x165   : > { %v1511_v5 = vpop.f32.mrf.mxu3  ;;  %v1061_v24 = vpop.f32.mrf.mxu1 }
 0x166   : > { %v1570_v61 = vadd.f32 %v1511_v5, %v1436_v18  ;;  %v1062_v63 = vadd.f32 %v1061_v24, %v3403_v16 }
 0x167   : > { %2752 = vmatmul.msk.bf16.gmra.mxu0 %vm739_vm4, %v3757_v22 }
 0x168   : > { %v1379_v51 = vpop.f32.mrf.mxu2  ;;  %2755 = vmatmul.msk.bf16.vlgmr.msra.gmra.mxu1 %vm739_vm4, %v3337_v55  ;;  %v3764_v58 = vadd.f32 %v1667_v34, %v1570_v61 }
 0x169   : > { %v1437_v38 = vadd.f32 %v1379_v51, %v1059_v26 }
 0x16c   : > { %v1669_v60 = vpop.f32.mrf.mxu0 }
 0x16d   : > { %v1513_v9 = vpop.f32.mrf.mxu3  ;;  %2776 = vmatmul.msk.bf16.vlgmr.msra.gmra.mxu2 %vm739_vm4, %v3349_v6  ;;  %v1063_v43 = vpop.f32.mrf.mxu1 }
 0x16e   : > { %v1571_v17 = vadd.f32 %v1513_v9, %v1437_v38  ;;  %v1064_v6 = vadd.f32 %v1063_v43, %v3425_v57 }
 0x170   : > { %v1382_v15 = vpop.f32.mrf.mxu2  ;;  %v3769_v31 = vadd.f32 %v1669_v60, %v1571_v17 }
 0x171   : > { %v1438_v0 = vadd.f32 %v1382_v15, %v1062_v63 }
 0x172   : > { %2793 = vmatmul.msk.bf16.vlgmr.msra.gmra.mxu3 %vm739_vm4, %v3240_v45 }
 0x174   : > { %v1672_v55 = vpop.f32.mrf.mxu0 }
 0x175   : > { %v1516_v47 = vpop.f32.mrf.mxu3  ;;  %v1066_v48 = vpop.f32.mrf.mxu1 }
 0x176   : > { %v1572_v2 = vadd.f32 %v1516_v47, %v1438_v0  ;;  %v1067_v24 = vadd.f32 %v1066_v48, %v3445_v59 }
 0x177   : > { %2811 = vmatmul.msk.bf16.vlgmr.msra.gmra.mxu0 %vm739_vm4, %v3363_v52 }
 0x178   : > { %v1384_v39 = vpop.f32.mrf.mxu2  ;;  %2756 = vmatmul.msk.bf16.gmra.mxu1 %vm739_vm4, %v3363_v52  ;;  %v3778_v16 = vadd.f32 %v1672_v55, %v1572_v2 }
 0x179   : > { %v1439_v29 = vadd.f32 %v1384_v39, %v1064_v6 }
 0x17c   : > { %v1674_v18 = vpop.f32.mrf.mxu0 }
 0x17d   : > { %v1518_v34 = vpop.f32.mrf.mxu3  ;;  %2777 = vmatmul.msk.bf16.gmra.mxu2 %vm739_vm4, %v3369_v41  ;;  %v1068_v45 = vpop.f32.mrf.mxu1 }
 0x17e   : > { %v1573_v5 = vadd.f32 %v1518_v34, %v1439_v29  ;;  %v1069_v41 = vadd.f32 %v1068_v45, %v3463_v3 }
 0x180   : > { %v1387_v61 = vpop.f32.mrf.mxu2  ;;  %v3783_v26 = vadd.f32 %v1674_v18, %v1573_v5 }
 0x181   : > { %v1440_v57 = vadd.f32 %v1387_v61, %v1067_v24 }
 0x182   : > { %2794 = vmatmul.msk.bf16.gmra.mxu3 %vm739_vm4, %v3330_v20 }
 0x184   : > { %v1677_v52 = vpop.f32.mrf.mxu0 }
 0x185   : > { %v1521_v51 = vpop.f32.mrf.mxu3  ;;  %v1071_v38 = vpop.f32.mrf.mxu1 }
 0x186   : > { %v1574_v60 = vadd.f32 %v1521_v51, %v1440_v57  ;;  %v1072_v0 = vadd.f32 %v1071_v38, %v3482_v23 }
 0x187   : > { %2812 = vmatmul.msk.bf16.gmra.mxu0 %vm739_vm4, %v3383_v40 }
 0x188   : > { %v1389_v9 = vpop.f32.mrf.mxu2  ;;  %2757 = vmatmul.msk.bf16.gmra.mxu1 %vm739_vm4, %v3383_v40  ;;  %v3792_v59 = vadd.f32 %v1677_v52, %v1574_v60 }
 0x189   : > { %v1441_v43 = vadd.f32 %v1389_v9, %v1069_v41 }
 0x18c   : > { %v1679_v17 = vpop.f32.mrf.mxu0 }
 0x18d   : > { %v1523_v63 = vpop.f32.mrf.mxu3  ;;  %2778 = vmatmul.msk.bf16.gmra.mxu2 %vm739_vm4, %v3391_v8  ;;  %v1073_v20 = vpop.f32.mrf.mxu1 }
 0x18e   : > { %v1575_v15 = vadd.f32 %v1523_v63, %v1441_v43  ;;  %v1074_v8 = vadd.f32 %v1073_v20, %v3503_v1  ;;  %v4218_v43 = vld [vmem:[#allocation18_spill] sm:$0xff]  ;;  %v4219_v63 = vld [vmem:[#allocation16_spill] sm:$0xff] }
 0x190   : > { %v1392_v55 = vpop.f32.mrf.mxu2  ;;  %v3797_v47 = vadd.f32 %v1679_v17, %v1575_v15 }
 0x191   : > { %v1442_v3 = vadd.f32 %v1392_v55, %v1072_v0  ;;  %v4220_v55 = vld [vmem:[#allocation8_spill] sm:$0xff] }
 0x192   : > { %2795 = vmatmul.msk.bf16.gmra.mxu3 %vm739_vm4, %v3012_v62 }
 0x194   : > { %v1682_v40 = vpop.f32.mrf.mxu0 }
 0x195   : > { %v1526_v48 = vpop.f32.mrf.mxu3  ;;  %v1076_v2 = vpop.f32.mrf.mxu1 }
 0x196   : > { %v1576_v6 = vadd.f32 %v1526_v48, %v1442_v3  ;;  %v1077_v5 = vadd.f32 %v1076_v2, %v3525_v56  ;;  %v4221_v2 = vld [vmem:[#allocation21_spill] sm:$0xff] }
 0x197   : > { %2813 = vmatmul.msk.bf16.gmra.mxu0 %vm739_vm4, %v3411_v12 }
 0x198   : > { %v1394_v39 = vpop.f32.mrf.mxu2  ;;  %2758 = vmatmul.msk.bf16.gmra.mxu1 %vm739_vm4, %v3411_v12  ;;  %v3806_v23 = vadd.f32 %v1682_v40, %v1576_v6  ;;  %v4222_v6 = vld [vmem:[#allocation17_spill] sm:$0xff] }
 0x199   : > { %v1443_v29 = vadd.f32 %v1394_v39, %v1074_v8 }
 0x19c   : > { %v1684_v18 = vpop.f32.mrf.mxu0 }
 0x19d   : > { %v1528_v34 = vpop.f32.mrf.mxu3  ;;  %2779 = vmatmul.msk.bf16.gmra.mxu2 %vm739_vm4, %v3419_v27  ;;  %v1078_v62 = vpop.f32.mrf.mxu1 }
 0x19e   : > { %v1577_v45 = vadd.f32 %v1528_v34, %v1443_v29  ;;  %v1079_v27 = vadd.f32 %v1078_v62, %v3540_v44 }
 0x1a0   : > { %v1397_v24 = vpop.f32.mrf.mxu2  ;;  %v3811_v61 = vadd.f32 %v1684_v18, %v1577_v45  ;;  %v4223_v45 = vld [vmem:[#allocation22_spill] sm:$0xff] }
 0x1a1   : > { %v1444_v1 = vadd.f32 %v1397_v24, %v1077_v5 }
 0x1a2   : > { %2796 = vmatmul.msk.bf16.gmra.mxu3 %vm739_vm4, %v3086_v37 }
 0x1a4   : > { %v1687_v12 = vpop.f32.mrf.mxu0 }
 0x1a5   : > { %v1531_v57 = vpop.f32.mrf.mxu3  ;;  %v1081_v52 = vpop.f32.mrf.mxu1 }
 0x1a6   : > { %v1578_v51 = vadd.f32 %v1531_v57, %v1444_v1  ;;  %v1082_v20 = vadd.f32 %v1081_v52, %v4219_v63  ;;  %v4224_v1 = vld [vmem:[#allocation19_spill] sm:$0xff] }
 0x1a7   : > { %2814 = vmatmul.msk.bf16.gmra.mxu0 %vm739_vm4, %v3443_v33 }
 0x1a8   : > { %v1399_v38 = vpop.f32.mrf.mxu2  ;;  %2759 = vmatmul.msk.bf16.gmra.mxu1 %vm739_vm4, %v3443_v33  ;;  %v3820_v56 = vadd.f32 %v1687_v12, %v1578_v51 }
 0x1a9   : > { %v1445_v60 = vadd.f32 %v1399_v38, %v1079_v27  ;;  %v4225_v27 = vld [vmem:[#allocation14_spill] sm:$0xff] }
 0x1ac   : > { %v1689_v41 = vpop.f32.mrf.mxu0 }
 0x1ad   : > { %v1533_v9 = vpop.f32.mrf.mxu3  ;;  %2780 = vmatmul.msk.bf16.gmra.mxu2 %vm739_vm4, %v4218_v43  ;;  %v1083_v37 = vpop.f32.mrf.mxu1  ;;  %v4226_v43 = vld [vmem:[#allocation24_spill] sm:$0xff] }
 0x1ae   : > { %v1579_v17 = vadd.f32 %v1533_v9, %v1445_v60  ;;  %v1084_v8 = vadd.f32 %v1083_v37, %v4222_v6  ;;  %v4227_v37 = vld [vmem:[#allocation20_spill] sm:$0xff] }
 0x1b0   : > { %v1402_v15 = vpop.f32.mrf.mxu2  ;;  %v3825_v0 = vadd.f32 %v1689_v41, %v1579_v17 }
 0x1b1   : > { %v1446_v44 = vadd.f32 %v1402_v15, %v1082_v20 }
 0x1b2   : > { %2797 = vmatmul.msk.bf16.gmra.mxu3 %vm739_vm4, %v4220_v55 }
 0x1b4   : > { %v1692_v33 = vpop.f32.mrf.mxu0 }
 0x1b5   : > { %v1536_v3 = vpop.f32.mrf.mxu3  ;;  %v1086_v40 = vpop.f32.mrf.mxu1 }
 0x1b6   : > { %v1580_v48 = vadd.f32 %v1536_v3, %v1446_v44  ;;  %v1087_v12 = vadd.f32 %v1086_v40, %v4224_v1  ;;  %v4232_v1 = vld [vmem:[#allocation25_spill] sm:$0xff] }
 0x1b7   : > { %2815 = vmatmul.msk.bf16.gmra.mxu0 %vm739_vm4, %v4221_v2 }
 0x1b8   : > { %v1404_v39 = vpop.f32.mrf.mxu2  ;;  %2760 = vmatmul.msk.bf16.gmra.mxu1 %vm739_vm4, %v4221_v2  ;;  %v3834_v29 = vadd.f32 %v1692_v33, %v1580_v48  ;;  %v4228_v33 = vld [vmem:[#allocation26_spill] sm:$0xff]  ;;  %v4229_v48 = vld [vmem:[#allocation23_spill] sm:$0xff] }
 0x1b9   : > { %v1447_v18 = vadd.f32 %v1404_v39, %v1084_v8 }
 0x1bc   : > { %v1694_v34 = vpop.f32.mrf.mxu0 }
 0x1bd   : > { %v1538_v62 = vpop.f32.mrf.mxu3  ;;  %2781 = vmatmul.msk.bf16.gmra.mxu2 %vm739_vm4, %v4223_v45  ;;  %v1088_v5 = vpop.f32.mrf.mxu1 }
 0x1be   : > { %v1581_v24 = vadd.f32 %v1538_v62, %v1447_v18  ;;  %v1089_v17 = vadd.f32 %v1088_v5, %v4227_v37  ;;  %v4230_v18 = vld [vmem:[#allocation2_spill] sm:$0xff] }
 0x1c0   : > { %v1407_v57 = vpop.f32.mrf.mxu2  ;;  %v3839_v52 = vadd.f32 %v1694_v34, %v1581_v24  ;;  %v4231_v24 = vld [vmem:[#allocation28_spill] sm:$0xff] }
 0x1c1   : > { %v1448_v51 = vadd.f32 %v1407_v57, %v1087_v12 }
 0x1c2   : > { %2798 = vmatmul.msk.bf16.gmra.mxu3 %vm739_vm4, %v4225_v27 }
 0x1c4   : > { %v1697_v38 = vpop.f32.mrf.mxu0 }
 0x1c5   : > { %v1541_v60 = vpop.f32.mrf.mxu3  ;;  %v1091_v41 = vpop.f32.mrf.mxu1 }
 0x1c6   : > { %v1582_v9 = vadd.f32 %v1541_v60, %v1448_v51  ;;  %v1092_v2 = vadd.f32 %v1091_v41, %v4229_v48 }
 0x1c7   : > { %2816 = vmatmul.msk.bf16.gmra.mxu0 %vm739_vm4, %v4226_v43 }
 0x1c8   : > { %v1409_v63 = vpop.f32.mrf.mxu2  ;;  %2761 = vmatmul.msk.bf16.gmra.mxu1 %vm739_vm4, %v4226_v43  ;;  %v3848_v20 = vadd.f32 %v1697_v38, %v1582_v9  ;;  %v4233_v43 = vld [vmem:[#allocation27_spill] sm:$0xff] }
 0x1c9   : > { %v1449_v15 = vadd.f32 %v1409_v63, %v1089_v17 }
 0x1cc   : > { %v1699_v44 = vpop.f32.mrf.mxu0 }
 0x1cd   : > { %v1543_v55 = vpop.f32.mrf.mxu3  ;;  %2782 = vmatmul.msk.bf16.gmra.mxu2 %vm739_vm4, %v4228_v33  ;;  %v1093_v3 = vpop.f32.mrf.mxu1 }
 0x1ce   : > { %v1583_v40 = vadd.f32 %v1543_v55, %v1449_v15  ;;  %v1094_v12 = vadd.f32 %v1093_v3, %v4232_v1 }
 0x1d0   : > { %v1412_v6 = vpop.f32.mrf.mxu2  ;;  %v3853_v8 = vadd.f32 %v1699_v44, %v1583_v40  ;;  %v4234_v40 = vld [vmem:[#allocation29_spill] sm:$0xff] }
 0x1d1   : > { %v1450_v39 = vadd.f32 %v1412_v6, %v1092_v2 }
 0x1d2   : > { %2799 = vmatmul.msk.bf16.gmra.mxu3 %vm739_vm4, %v4230_v18 }
 0x1d4   : > { %v1702_v34 = vpop.f32.mrf.mxu0 }
 0x1d5   : > { %v1546_v62 = vpop.f32.mrf.mxu3  ;;  %v1096_v45 = vpop.f32.mrf.mxu1 }
 0x1d6   : > { %v1584_v5 = vadd.f32 %v1546_v62, %v1450_v39  ;;  %v1097_v37 = vadd.f32 %v1096_v45, %v4233_v43 }
 0x1d7   : > { %2817 = vmatmul.msk.bf16.gmra.mxu0 %vm739_vm4, %v4231_v24 }
 0x1d8   : > { %v1414_v57 = vpop.f32.mrf.mxu2  ;;  %2762 = vmatmul.msk.bf16.gmra.mxu1 %vm739_vm4, %v4231_v24  ;;  %v3862_v51 = vadd.f32 %v1702_v34, %v1584_v5 }
 0x1d9   : > { %v1451_v27 = vadd.f32 %v1414_v57, %v1094_v12 }
 0x1dc   : > { %v1704_v38 = vpop.f32.mrf.mxu0 }
 0x1dd   : > { %v1548_v60 = vpop.f32.mrf.mxu3  ;;  %2783 = vmatmul.msk.bf16.gmra.mxu2 %vm739_vm4, %v3555_v19  ;;  %v1098_v41 = vpop.f32.mrf.mxu1 }
 0x1de   : > { %v1585_v9 = vadd.f32 %v1548_v60, %v1451_v27  ;;  %v1099_v19 = vadd.f32 %v1098_v41, %v4234_v40 }
 0x1e0   : > { %v1417_v17 = vpop.f32.mrf.mxu2  ;;  %v3867_v63 = vadd.f32 %v1704_v38, %v1585_v9 }
 0x1e1   : > { %v1452_v15 = vadd.f32 %v1417_v17, %v1097_v37 }
 0x1e2   : > { %2800 = vmatmul.msk.bf16.gmra.mxu3 %vm739_vm4, %v3111_v4 }
 0x1e4   : > { %v1707_v44 = vpop.f32.mrf.mxu0 }
 0x1e5   : > { %v1551_v55 = vpop.f32.mrf.mxu3  ;;  %v1772_v33 = vpop.f32.mrf.mxu1 }
 0x1e6   : > { %v1586_v3 = vadd.f32 %v1551_v55, %v1452_v15  ;;  %v1852_v62 = vadd.f32 %v1772_v33, %v3570_v32  ;;  %v4235_v33 = vld [vmem:[#allocation15_spill] sm:$0xff] }
 0x1e7   : > { %2818 = vmatmul.msk.bf16.gmra.mxu0 %vm739_vm4, %v3572_v10 }
 0x1e8   : > { %v1419_v48 = vpop.f32.mrf.mxu2  ;;  %2763 = vmatmul.msk.bf16.gmra.mxu1 %vm739_vm4, %v3572_v10  ;;  %v3876_v2 = vadd.f32 %v1707_v44, %v1586_v3 }
 0x1e9   : > { %v1453_v6 = vadd.f32 %v1419_v48, %v1099_v19 }
 0x1ec   : > { %v1709_v39 = vpop.f32.mrf.mxu0 }
 0x1ed   : > { %v1553_v18 = vpop.f32.mrf.mxu3  ;;  %2784 = vmatmul.msk.bf16.gmra.mxu2 %vm739_vm4, %v3579_v42  ;;  %v1774_v4 = vpop.f32.mrf.mxu1  ;;  %v3888_v42 = vld [vmem:[%s4116_s2] ss:$0 sm:$0xff] }
 0x1ee   : > { %v1587_v34 = vadd.f32 %v1553_v18, %v1453_v6  ;;  %v1853_v27 = vadd.f32 %v1774_v4, %v3583_v35  ;;  %v4236_v18 = vld [vmem:[#allocation31_spill] sm:$0xff]  ;;  %v4237_v4 = vld [vmem:[#allocation9_spill] sm:$0xff] }
 0x1f0   : > { %v1906_v45 = vpop.f32.mrf.mxu2  ;;  %v3881_v5 = vadd.f32 %v1709_v39, %v1587_v34 }
 0x1f1   : > { %v1986_v10 = vadd.f32 %v1906_v45, %v1852_v62 }
 0x1f2   : > { %2801 = vmatmul.msk.bf16.gmra.mxu3 %vm739_vm4, %v3196_v25 }
 0x1f4   : > { %v2202_v24 = vpop.f32.mrf.mxu0 }
 0x1f5   : > { %v2062_v1 = vpop.f32.mrf.mxu3  ;;  %v1777_v12 = vpop.f32.mrf.mxu1 }
 0x1f6   : > { %v2142_v57 = vadd.f32 %v2062_v1, %v1986_v10  ;;  %v1854_v15 = vadd.f32 %v1777_v12, %v3596_v21 }
 0x1f7   : > { %2819 = vmatmul.msk.bf16.gmra.mxu0 %vm739_vm4, %v3598_v13 }
 0x1f8   : > { %v2282_v32 = vadd.f32 %v2202_v24, %v2142_v57  ;;  %v1908_v38 = vpop.f32.mrf.mxu2  ;;  %2764 = vmatmul.msk.bf16.gmra.mxu1 %vm739_vm4, %v3598_v13  ;;  %v4238_v57 = vld [vmem:[#allocation32_spill] sm:$0xff] }
 0x1f9   : > { %v1987_v60 = vadd.f32 %v1908_v38, %v1853_v27 }
 0x1fa   : > { %v2318_v25 = vadd.f32 %v3888_v42, %v2282_v32 }
 0x1fc   : > { %v2350_v41 = vmax.f32 %v2318_v25, 0.0  ;;  %v2204_v9 = vpop.f32.mrf.mxu0 }
 0x1fd   : > { %v2064_v43 = vpop.f32.mrf.mxu3  ;;  %2785 = vmatmul.msk.bf16.gmra.mxu2 %vm739_vm4, %v3605_v50  ;;  %v1779_v35 = vpop.f32.mrf.mxu1 }
 0x1fe   : > { %v2382_v37 = vmin.f32 %v2350_v41, 6.0  ;;  %v2143_v13 = vadd.f32 %v2064_v43, %v1987_v60  ;;  %v1855_v34 = vadd.f32 %v1779_v35, %v4237_v4  ;;  %v4239_v60 = vld [vmem:[#allocation30_spill] sm:$0xff]  ;;  %v4240_v35 = vld [vmem:[#allocation3_spill] sm:$0xff] }
 0x200   : > { %2414 = vst.msk [vmem:[%s3900_s20] sm:$0xff] %vm739_vm4, %v2382_v37  ;;  %v2283_v17 = vadd.f32 %v2204_v9, %v2143_v13  ;;  %v1911_v44 = vpop.f32.mrf.mxu2 }
 0x201   : > { %v1988_v3 = vadd.f32 %v1911_v44, %v1854_v15 }
 0x202   : > { %v2319_v55 = vadd.f32 %v3888_v42, %v2283_v17  ;;  %2802 = vmatmul.msk.bf16.gmra.mxu3 %vm739_vm4, %v4235_v33 }
 0x204   : > { %v2351_v40 = vmax.f32 %v2319_v55, 0.0  ;;  %v2207_v19 = vpop.f32.mrf.mxu0 }
 0x205   : > { %v2067_v48 = vpop.f32.mrf.mxu3  ;;  %v1782_v50 = vpop.f32.mrf.mxu1 }
 0x206   : > { %v2383_v6 = vmin.f32 %v2351_v40, 6.0  ;;  %v2144_v39 = vadd.f32 %v2067_v48, %v1988_v3  ;;  %v1856_v41 = vadd.f32 %v1782_v50, %v4239_v60  ;;  %v4241_v3 = vld [vmem:[#allocation35_spill] sm:$0xff] }
 0x207   : > { %2820 = vmatmul.msk.bf16.gmra.mxu0 %vm739_vm4, %v4236_v18 }
 0x208   : > { %2415 = vst.msk [vmem:[%s3900_s20 + $0x8] sm:$0xff] %vm739_vm4, %v2383_v6  ;;  %v2284_v21 = vadd.f32 %v2207_v19, %v2144_v39  ;;  %v1913_v62 = vpop.f32.mrf.mxu2  ;;  %2765 = vmatmul.msk.bf16.gmra.mxu1 %vm739_vm4, %v4236_v18  ;;  %v4242_v19 = vld [vmem:[#allocation33_spill] sm:$0xff] }
 0x209   : > { %v1989_v10 = vadd.f32 %v1913_v62, %v1855_v34  ;;  %v4243_v34 = vld [vmem:[#allocation36_spill] sm:$0xff] }
 0x20a   : > { %v2320_v45 = vadd.f32 %v3888_v42, %v2284_v21 }
 0x20c   : > { %v2352_v24 = vmax.f32 %v2320_v45, 0.0  ;;  %v2209_v1 = vpop.f32.mrf.mxu0 }
 0x20d   : > { %v2069_v12 = vpop.f32.mrf.mxu3  ;;  %2786 = vmatmul.msk.bf16.gmra.mxu2 %vm739_vm4, %v4238_v57  ;;  %v1784_v32 = vpop.f32.mrf.mxu1 }
 0x20e   : > { %v2384_v27 = vmin.f32 %v2352_v24, 6.0  ;;  %v2145_v38 = vadd.f32 %v2069_v12, %v1989_v10  ;;  %v1857_v48 = vadd.f32 %v1784_v32, %v4242_v19 }
 0x210   : > { %2416 = vst.msk [vmem:[%s3900_s20 + $0x10] sm:$0xff] %vm739_vm4, %v2384_v27  ;;  %v2285_v25 = vadd.f32 %v2209_v1, %v2145_v38  ;;  %v1916_v9 = vpop.f32.mrf.mxu2  ;;  %v4244_v1 = vld [vmem:[#allocation34_spill] sm:$0xff]  ;;  %v4245_v27 = vld [vmem:[#allocation4_spill] sm:$0xff] }
 0x211   : > { %v1990_v37 = vadd.f32 %v1916_v9, %v1856_v41 }
 0x212   : > { %v2321_v43 = vadd.f32 %v3888_v42, %v2285_v25  ;;  %2803 = vmatmul.msk.bf16.gmra.mxu3 %vm739_vm4, %v4240_v35 }
 0x214   : > { %v2353_v13 = vmax.f32 %v2321_v43, 0.0  ;;  %v2212_v17 = vpop.f32.mrf.mxu0 }
 0x215   : > { %v2072_v15 = vpop.f32.mrf.mxu3  ;;  %v1787_v44 = vpop.f32.mrf.mxu1 }
 0x216   : > { %v2385_v55 = vmin.f32 %v2353_v13, 6.0  ;;  %v2146_v33 = vadd.f32 %v2072_v15, %v1990_v37  ;;  %v1858_v12 = vadd.f32 %v1787_v44, %v4244_v1  ;;  %v4246_v37 = vld [vmem:[#allocation39_spill] sm:$0xff] }
 0x217   : > { %2821 = vmatmul.msk.bf16.gmra.mxu0 %vm739_vm4, %v4241_v3 }
 0x218   : > { %2417 = vst.msk [vmem:[%s3900_s20 + $0x18] sm:$0xff] %vm739_vm4, %v2385_v55  ;;  %v2286_v40 = vadd.f32 %v2212_v17, %v2146_v33  ;;  %v1918_v50 = vpop.f32.mrf.mxu2  ;;  %2766 = vmatmul.msk.bf16.gmra.mxu1 %vm739_vm4, %v4241_v3  ;;  %v4247_v17 = vld [vmem:[#allocation37_spill] sm:$0xff] }
 0x219   : > { %v1991_v39 = vadd.f32 %v1918_v50, %v1857_v48  ;;  %v4248_v48 = vld [vmem:[#allocation6_spill] sm:$0xff] }
 0x21a   : > { %v2322_v6 = vadd.f32 %v3888_v42, %v2286_v40 }
 0x21c   : > { %v2354_v18 = vmax.f32 %v2322_v6, 0.0  ;;  %v2214_v21 = vpop.f32.mrf.mxu0 }
 0x21d   : > { %v2074_v4 = vpop.f32.mrf.mxu3  ;;  %2787 = vmatmul.msk.bf16.gmra.mxu2 %vm739_vm4, %v4243_v34  ;;  %v1789_v62 = vpop.f32.mrf.mxu1 }
 0x21e   : > { %v2386_v45 = vmin.f32 %v2354_v18, 6.0  ;;  %v2147_v10 = vadd.f32 %v2074_v4, %v1991_v39  ;;  %v1859_v15 = vadd.f32 %v1789_v62, %v4247_v17 }
 0x220   : > { %2418 = vst.msk [vmem:[%s3900_s20 + $0x20] sm:$0xff] %vm739_vm4, %v2386_v45  ;;  %v2287_v24 = vadd.f32 %v2214_v21, %v2147_v10  ;;  %v1921_v57 = vpop.f32.mrf.mxu2  ;;  %v4249_v21 = vld [vmem:[#allocation38_spill] sm:$0xff] }
 0x221   : > { %v1992_v38 = vadd.f32 %v1921_v57, %v1858_v12  ;;  %v4250_v45 = vld [vmem:[#allocation10_spill] sm:$0xff] }
 0x222   : > { %v2323_v32 = vadd.f32 %v3888_v42, %v2287_v24  ;;  %2804 = vmatmul.msk.bf16.gmra.mxu3 %vm739_vm4, %v4245_v27 }
 0x224   : > { %v2355_v25 = vmax.f32 %v2323_v32, 0.0  ;;  %v2217_v60 = vpop.f32.mrf.mxu0 }
 0x225   : > { %v2077_v41 = vpop.f32.mrf.mxu3  ;;  %v1792_v9 = vpop.f32.mrf.mxu1 }
 0x226   : > { %v2387_v43 = vmin.f32 %v2355_v25, 6.0  ;;  %v2148_v35 = vadd.f32 %v2077_v41, %v1992_v38  ;;  %v1860_v4 = vadd.f32 %v1792_v9, %v4249_v21  ;;  %v4251_v38 = vld [vmem:[#allocation41_spill] sm:$0xff]  ;;  %v3976_v21 = vld [vmem:[%s2973_s29 + $0xcc] sm:$0xf] }
 0x227   : > { %2822 = vmatmul.msk.bf16.gmra.mxu0 %vm739_vm4, %v4246_v37 }
 0x228   : > { %2419 = vst.msk [vmem:[%s3900_s20 + $0x28] sm:$0xff] %vm739_vm4, %v2387_v43  ;;  %v2288_v13 = vadd.f32 %v2217_v60, %v2148_v35  ;;  %v1923_v44 = vpop.f32.mrf.mxu2  ;;  %2767 = vmatmul.msk.bf16.gmra.mxu1 %vm739_vm4, %v4246_v37  ;;  %v4252_v60 = vld [vmem:[#allocation7_spill] sm:$0xff] }
 0x229   : > { %v1993_v33 = vadd.f32 %v1923_v44, %v1859_v15 }
 0x22a   : > { %v2324_v55 = vadd.f32 %v3888_v42, %v2288_v13 }
 0x22c   : > { %v2356_v3 = vmax.f32 %v2324_v55, 0.0  ;;  %v2219_v40 = vpop.f32.mrf.mxu0 }
 0x22d   : > { %v2079_v19 = vpop.f32.mrf.mxu3  ;;  %2788 = vmatmul.msk.bf16.gmra.mxu2 %vm739_vm4, %v4248_v48  ;;  %v1794_v50 = vpop.f32.mrf.mxu1 }
 0x22e   : > { %v2388_v6 = vmin.f32 %v2356_v3, 6.0  ;;  %v2149_v39 = vadd.f32 %v2079_v19, %v1993_v33  ;;  %v1861_v41 = vadd.f32 %v1794_v50, %v4252_v60  ;;  %v4253_v3 = vld [vmem:[#allocation40_spill] sm:$0xff] }
 0x230   : > { %2420 = vst.msk [vmem:[%s3900_s20 + $0x30] sm:$0xff] %vm739_vm4, %v2388_v6  ;;  %v2289_v18 = vadd.f32 %v2219_v40, %v2149_v39  ;;  %v1926_v34 = vpop.f32.mrf.mxu2 }
 0x231   : > { %v1994_v10 = vadd.f32 %v1926_v34, %v1860_v4  ;;  %v3979_v4 = vld [vmem:[%s2973_s29 + $0xd0] sm:$0xf] }
 0x232   : > { %v2325_v62 = vadd.f32 %v3888_v42, %v2289_v18  ;;  %2805 = vmatmul.msk.bf16.gmra.mxu3 %vm739_vm4, %v4250_v45  ;;  %v4254_v18 = vld [vmem:[#allocation42_spill] sm:$0xff] }
 0x234   : > { %v2357_v24 = vmax.f32 %v2325_v62, 0.0  ;;  %v2222_v1 = vpop.f32.mrf.mxu0 }
 0x235   : > { %v2082_v12 = vpop.f32.mrf.mxu3  ;;  %v1797_v57 = vpop.f32.mrf.mxu1 }
 0x236   : > { %v2389_v32 = vmin.f32 %v2357_v24, 6.0  ;;  %v2150_v27 = vadd.f32 %v2082_v12, %v1994_v10  ;;  %v1862_v40 = vadd.f32 %v1797_v57, %v4253_v3  ;;  %v4255_v24 = vld [vmem:[#allocation5_spill] sm:$0xff]  ;;  %v2022_v12 = vshll.u32 %v3976_v21, 16 }
 0x237   : > { %2823 = vmatmul.msk.bf16.gmra.mxu0 %vm739_vm4, %v4251_v38  ;;  %v2028_v57 = vshll.u32 %v3979_v4, 16 }
 0x238   : > { %2421 = vst.msk [vmem:[%s3900_s20 + $0x38] sm:$0xff] %vm739_vm4, %v2389_v32  ;;  %v2290_v25 = vadd.f32 %v2222_v1, %v2150_v27  ;;  %v1928_v9 = vpop.f32.mrf.mxu2  ;;  %2768 = vmatmul.msk.bf16.gmra.mxu1 %vm739_vm4, %v4251_v38  ;;  %v2753_v1 = vrot.slane %v4255_v24, 9  ;;  %v2032_v32 = vshrl.u32 %v3979_v4, 16 }
 0x239   : > { %v1995_v35 = vadd.f32 %v1928_v9, %v1861_v41  ;;  %v1750_v41 = vrot.slane %v3725_v11, 5 }
 0x23a   : > { %v2326_v43 = vadd.f32 %v3888_v42, %v2290_v25 }
 0x23c   : > { %v2358_v37 = vmax.f32 %v2326_v43, 0.0  ;;  %v2224_v13 = vpop.f32.mrf.mxu0 }
 0x23d   : > { %v2084_v17 = vpop.f32.mrf.mxu3  ;;  %2789 = vmatmul.msk.bf16.gmra.mxu2 %vm739_vm4, %v3718_v30  ;;  %v1799_v15 = vpop.f32.mrf.mxu1  ;;  %v1747_v30 = vrot.slane %v4254_v18, 5 }
 0x23e   : > { %v2390_v44 = vmin.f32 %v2358_v37, 6.0  ;;  %v2151_v55 = vadd.f32 %v2084_v17, %v1995_v35  ;;  %v1863_v38 = vadd.f32 %v1799_v15, %v3722_v49  ;;  %v2030_v17 = vrot.slane %v2028_v57, 5 }
 0x23f   : > { %v1749_v60 = vrot.slane %v1747_v30, 4  ;;  %v1748_v35 = vsel %vm3303_vm7, %v2753_v1, %v1747_v30 }
 0x240   : > { %2422 = vst.msk [vmem:[%s3900_s20 + $0x40] sm:$0xff] %vm739_vm4, %v2390_v44  ;;  %v2291_v33 = vadd.f32 %v2224_v13, %v2151_v55  ;;  %v1931_v19 = vpop.f32.mrf.mxu2  ;;  %v2024_v13 = vrot.slane %v2022_v12, 5  ;;  %v2034_v44 = vrot.slane %v2032_v32, 4  ;;  %v2177_v32 = vrot.slane %v3979_v4, 5 }
 0x241   : > { %v1996_v50 = vadd.f32 %v1931_v19, %v1862_v40  ;;  %v1751_v15 = vsel %vm3303_vm7, %v1749_v60, %v1750_v41  ;;  %v1754_v19 = vunpack.c.l.b16 %v1748_v35  ;;  %v2809_v60 = vrot.slane %v3976_v21, 9 }
 0x242   : > { %v2327_v48 = vadd.f32 %v3888_v42, %v2291_v33  ;;  %2806 = vmatmul.msk.bf16.gmra.mxu3 %vm739_vm4, %v3312_v53  ;;  %v2019_v53 = vshrl.u32 %v3976_v21, 16 }
 0x243   : > { %v2178_v21 = vsel %vm3303_vm7, %v2809_v60, %v2177_v32 }
 0x244   : > { %v2359_v6 = vmax.f32 %v2327_v48, 0.0  ;;  %v2227_v39 = vpop.f32.mrf.mxu0  ;;  %v2021_v37 = vrot.slane %v2019_v53, 4  ;;  %v1755_v48 = vunpack.c.l.b16 %v1751_v15 }
 0x245   : > { %v2087_v34 = vpop.f32.mrf.mxu3  ;;  %v1802_v62 = vpop.f32.mrf.mxu1 }
 0x246   : > { %v2391_v45 = vmin.f32 %v2359_v6, 6.0  ;;  %v2152_v10 = vadd.f32 %v2087_v34, %v1996_v50  ;;  %v2025_v50 = vor.u32 %v2024_v13, %v2021_v37  ;;  %v2035_v6 = vor.u32 %v2034_v44, %v2030_v17  ;;  %v2847_v37 = vld [vmem:[%s2973_s29 + $0xcc] sm:$0xff] }
 0x247   : > { %2824 = vmatmul.msk.bf16.gmra.mxu0 %vm739_vm4, %v3741_v46  ;;  %v1864_v30 = vadd.f32 %v1802_v62, %v3739_v7 }
 0x248   : > { %2423 = vst.msk [vmem:[%s3900_s20 + $0x48] sm:$0xff] %vm739_vm4, %v2391_v45  ;;  %v2292_v27 = vadd.f32 %v2227_v39, %v2152_v10  ;;  %v1933_v25 = vpop.f32.mrf.mxu2  ;;  %2769 = vmatmul.msk.bf16.gmra.mxu1 %vm739_vm4, %v3741_v46  ;;  %v300_v46 = vld [vmem:[%s2973_s29 + $0xd4] sm:$0x1]  ;;  %v1756_v10 = vpack.c.b16 %v1755_v48, %v1754_v19  ;;  %v2026_v24 = vrot.slane %v2025_v50, 4  ;;  %v2036_v1 = vrot.slane %v2035_v6, 4 }
 0x249   : > { %v1997_v43 = vadd.f32 %v1933_v25, %v1863_v38  ;;  %v2038_v39 = vshll.u32 %v300_v46, 16  ;;  %v2180_v35 = vrot.slane %v300_v46, 5 }
 0x24a   : > { %v2328_v9 = vadd.f32 %v3888_v42, %v2292_v27 }
 0x24b   : > { %v2040_v53 = vrot.slane %v2038_v39, 5 }
 0x24c   : > { %v2360_v55 = vmax.f32 %v2328_v9, 0.0  ;;  %v2229_v49 = vpop.f32.mrf.mxu0 }
 0x24d   : > { %v2089_v33 = vpop.f32.mrf.mxu3  ;;  %2790 = vmatmul.msk.bf16.gmra.mxu2 %vm739_vm4, %v3750_v54  ;;  %v1804_v11 = vpop.f32.mrf.mxu1  ;;  %v2041_v25 = vsel %vm3000_vm3, %v2036_v1, %v2040_v53 }
 0x24e   : > { %v2392_v3 = vmin.f32 %v2360_v55, 6.0  ;;  %v2153_v40 = vadd.f32 %v2089_v33, %v1997_v43  ;;  %v1865_v4 = vadd.f32 %v1804_v11, %v3753_v28  ;;  %v2179_v43 = vrot.slane %v2177_v32, 4 }
 0x24f   : > { %v2045_v36 = vunpack.c.l.b16 %v2041_v25 }
 0x250   : > { %2424 = vst.msk [vmem:[%s3900_s20 + $0x50] sm:$0xff] %vm739_vm4, %v2392_v3  ;;  %v2293_v18 = vadd.f32 %v2229_v49, %v2153_v40  ;;  %v1936_v34 = vpop.f32.mrf.mxu2  ;;  %v2181_v28 = vsel %vm3303_vm7, %v2179_v43, %v2180_v35  ;;  %v2184_v40 = vunpack.c.l.b16 %v2178_v21 }
 0x251   : > { %v1998_v54 = vadd.f32 %v1936_v34, %v1864_v30  ;;  %v2185_v19 = vunpack.c.l.b16 %v2181_v28 }
 0x252   : > { %v2329_v45 = vadd.f32 %v3888_v42, %v2293_v18  ;;  %2807 = vmatmul.msk.bf16.gmra.mxu3 %vm739_vm4, %v3757_v22  ;;  %v2031_v22 = vsel %vm3000_vm3, %v2026_v24, %v2030_v17 }
 0x253   : > { %v2044_v44 = vunpack.c.l.b16 %v2031_v22  ;;  %v2186_v18 = vpack.c.b16 %v2185_v19, %v2184_v40 }
 0x254   : > { %v2361_v12 = vmax.f32 %v2329_v45, 0.0  ;;  %v2232_v57 = vpop.f32.mrf.mxu0 }
 0x255   : > { %v2092_v27 = vpop.f32.mrf.mxu3  ;;  %v1807_v38 = vpop.f32.mrf.mxu1  ;;  %v2046_v3 = vpack.c.b16 %v2045_v36, %v2044_v44 }
 0x256   : > { %v2393_v7 = vmin.f32 %v2361_v12, 6.0  ;;  %v2154_v62 = vadd.f32 %v2092_v27, %v1998_v54  ;;  %v1866_v50 = vadd.f32 %v1807_v38, %v3764_v58 }
 0x257   : > { %2825 = vmatmul.msk.bf16.gmra.mxu0 %vm739_vm4, %v1756_v10 }
 0x258   : > { %2425 = vst.msk [vmem:[%s3900_s20 + $0x58] sm:$0xff] %vm739_vm4, %v2393_v7  ;;  %v2294_v41 = vadd.f32 %v2232_v57, %v2154_v62  ;;  %v1938_v9 = vpop.f32.mrf.mxu2  ;;  %2770 = vmatmul.msk.bf16.gmra.mxu1 %vm739_vm4, %v1756_v10 }
 0x259   : > { %v1999_v17 = vadd.f32 %v1938_v9, %v1865_v4 }
 0x25a   : > { %v2330_v13 = vadd.f32 %v3888_v42, %v2294_v41 }
 0x25c   : > { %v2362_v55 = vmax.f32 %v2330_v13, 0.0  ;;  %v2234_v49 = vpop.f32.mrf.mxu0 }
 0x25d   : > { %v2094_v15 = vpop.f32.mrf.mxu3  ;;  %2791 = vmatmul.msk.bf16.gmra.mxu2 %vm739_vm4, %v2847_v37  ;;  %v1809_v33 = vpop.f32.mrf.mxu1 }
 0x25e   : > { %v2394_v46 = vmin.f32 %v2362_v55, 6.0  ;;  %v2155_v11 = vadd.f32 %v2094_v15, %v1999_v17  ;;  %v1867_v58 = vadd.f32 %v1809_v33, %v3769_v31 }
 0x260   : > { %2426 = vst.msk [vmem:[%s3900_s20 + $0x60] sm:$0xff] %vm739_vm4, %v2394_v46  ;;  %v2295_v48 = vadd.f32 %v2234_v49, %v2155_v11  ;;  %v1941_v6 = vpop.f32.mrf.mxu2 }
 0x261   : > { %v2000_v14 = vadd.f32 %v1941_v6, %v1866_v50 }
 0x262   : > { %v2331_v39 = vadd.f32 %v3888_v42, %v2295_v48  ;;  %2808 = vmatmul.msk.bf16.gmra.mxu3 %vm739_vm4, %v2046_v3 }
 0x264   : > { %v2363_v30 = vmax.f32 %v2331_v39, 0.0  ;;  %v2237_v34 = vpop.f32.mrf.mxu0 }
 0x265   : > { %v2097_v45 = vpop.f32.mrf.mxu3  ;;  %v1812_v54 = vpop.f32.mrf.mxu1 }
 0x266   : > { %v2395_v10 = vmin.f32 %v2363_v30, 6.0  ;;  %v2156_v24 = vadd.f32 %v2097_v45, %v2000_v14  ;;  %v1868_v60 = vadd.f32 %v1812_v54, %v3778_v16 }
 0x267   : > { %2826 = vmatmul.msk.bf16.gmra.mxu0 %vm739_vm4, %v2186_v18 }
 0x268   : > { %2427 = vst.msk [vmem:[%s3900_s20 + $0x68] sm:$0xff] %vm739_vm4, %v2395_v10  ;;  %v2296_v1 = vadd.f32 %v2237_v34, %v2156_v24  ;;  %v1943_v53 = vpop.f32.mrf.mxu2 }
 0x269   : > { %v2001_v57 = vadd.f32 %v1943_v53, %v1867_v58 }
 0x26a   : > { %v2332_v12 = vadd.f32 %v3888_v42, %v2296_v1 }
 0x26c   : > { %v2364_v32 = vmax.f32 %v2332_v12, 0.0  ;;  %v2239_v27 = vpop.f32.mrf.mxu0 }
 0x26d   : > { %v2099_v38 = vpop.f32.mrf.mxu3  ;;  %v1814_v7 = vpop.f32.mrf.mxu1 }
 0x26e   : > { %v2396_v62 = vmin.f32 %v2364_v32, 6.0  ;;  %v2157_v22 = vadd.f32 %v2099_v38, %v2001_v57  ;;  %v1869_v36 = vadd.f32 %v1814_v7, %v3783_v26 }
 0x270   : > { %2428 = vst.msk [vmem:[%s3900_s20 + $0x70] sm:$0xff] %vm739_vm4, %v2396_v62  ;;  %v2297_v25 = vadd.f32 %v2239_v27, %v2157_v22  ;;  %v1946_v41 = vpop.f32.mrf.mxu2 }
 0x271   : > { %v2002_v31 = vadd.f32 %v1946_v41, %v1868_v60 }
 0x272   : > { %v2333_v4 = vadd.f32 %v3888_v42, %v2297_v25 }
 0x274   : > { %v2365_v9 = vmax.f32 %v2333_v4, 0.0  ;;  %v2242_v43 = vpop.f32.mrf.mxu0 }
 0x275   : > { %v2102_v35 = vpop.f32.mrf.mxu3  ;;  %v1817_v37 = vpop.f32.mrf.mxu1 }
 0x276   : > { %v2397_v13 = vmin.f32 %v2365_v9, 6.0  ;;  %v2158_v17 = vadd.f32 %v2102_v35, %v2002_v31  ;;  %v1870_v40 = vadd.f32 %v1817_v37, %v3792_v59 }
 0x278   : > { %2429 = vst.msk [vmem:[%s3900_s20 + $0x78] sm:$0xff] %vm739_vm4, %v2397_v13  ;;  %v2298_v44 = vadd.f32 %v2242_v43, %v2158_v17  ;;  %v1948_v55 = vpop.f32.mrf.mxu2 }
 0x279   : > { %v2003_v16 = vadd.f32 %v1948_v55, %v1869_v36 }
 0x27a   : > { %v2334_v49 = vadd.f32 %v3888_v42, %v2298_v44 }
 0x27c   : > { %v2366_v21 = vmax.f32 %v2334_v49, 0.0  ;;  %v2244_v28 = vpop.f32.mrf.mxu0 }
 0x27d   : > { %v2104_v15 = vpop.f32.mrf.mxu3  ;;  %v1819_v33 = vpop.f32.mrf.mxu1 }
 0x27e   : > { %v2398_v46 = vmin.f32 %v2366_v21, 6.0  ;;  %v2159_v11 = vadd.f32 %v2104_v15, %v2003_v16  ;;  %v1871_v45 = vadd.f32 %v1819_v33, %v3797_v47 }
 0x280   : > { %2430 = vst.msk [vmem:[%s3900_s20 + $0x80] sm:$0xff] %vm739_vm4, %v2398_v46  ;;  %v2299_v3 = vadd.f32 %v2244_v28, %v2159_v11  ;;  %v1951_v19 = vpop.f32.mrf.mxu2 }
 0x281   : > { %v2004_v26 = vadd.f32 %v1951_v19, %v1870_v40 }
 0x282   : > { %v2335_v48 = vadd.f32 %v3888_v42, %v2299_v3 }
 0x284   : > { %v2367_v50 = vmax.f32 %v2335_v48, 0.0  ;;  %v2247_v6 = vpop.f32.mrf.mxu0 }
 0x285   : > { %v2107_v39 = vpop.f32.mrf.mxu3  ;;  %v1822_v14 = vpop.f32.mrf.mxu1 }
 0x286   : > { %v2399_v18 = vmin.f32 %v2367_v50, 6.0  ;;  %v2160_v30 = vadd.f32 %v2107_v39, %v2004_v26  ;;  %v1872_v27 = vadd.f32 %v1822_v14, %v3806_v23 }
 0x288   : > { %2431 = vst.msk [vmem:[%s3900_s20 + $0x88] sm:$0xff] %vm739_vm4, %v2399_v18  ;;  %v2300_v34 = vadd.f32 %v2247_v6, %v2160_v30  ;;  %v1953_v54 = vpop.f32.mrf.mxu2 }
 0x289   : > { %v2005_v59 = vadd.f32 %v1953_v54, %v1871_v45 }
 0x28a   : > { %v2336_v10 = vadd.f32 %v3888_v42, %v2300_v34 }
 0x28c   : > { %v2368_v24 = vmax.f32 %v2336_v10, 0.0  ;;  %v2249_v1 = vpop.f32.mrf.mxu0 }
 0x28d   : > { %v2109_v58 = vpop.f32.mrf.mxu3  ;;  %v1824_v53 = vpop.f32.mrf.mxu1 }
 0x28e   : > { %v2400_v12 = vmin.f32 %v2368_v24, 6.0  ;;  %v2161_v57 = vadd.f32 %v2109_v58, %v2005_v59  ;;  %v1873_v9 = vadd.f32 %v1824_v53, %v3811_v61 }
 0x290   : > { %2432 = vst.msk [vmem:[%s3900_s20 + $0x90] sm:$0xff] %vm739_vm4, %v2400_v12  ;;  %v2301_v32 = vadd.f32 %v2249_v1, %v2161_v57  ;;  %v1956_v38 = vpop.f32.mrf.mxu2 }
 0x291   : > { %v2006_v47 = vadd.f32 %v1956_v38, %v1872_v27 }
 0x292   : > { %v2337_v7 = vadd.f32 %v3888_v42, %v2301_v32 }
 0x294   : > { %v2369_v62 = vmax.f32 %v2337_v7, 0.0  ;;  %v2252_v22 = vpop.f32.mrf.mxu0 }
 0x295   : > { %v2112_v25 = vpop.f32.mrf.mxu3  ;;  %v1827_v60 = vpop.f32.mrf.mxu1 }
 0x296   : > { %v2401_v41 = vmin.f32 %v2369_v62, 6.0  ;;  %v2162_v4 = vadd.f32 %v2112_v25, %v2006_v47  ;;  %v1874_v16 = vadd.f32 %v1827_v60, %v3820_v56 }
 0x298   : > { %2433 = vst.msk [vmem:[%s3900_s20 + $0x98] sm:$0xff] %vm739_vm4, %v2401_v41  ;;  %v2302_v31 = vadd.f32 %v2252_v22, %v2162_v4  ;;  %v1958_v43 = vpop.f32.mrf.mxu2 }
 0x299   : > { %v2007_v23 = vadd.f32 %v1958_v43, %v1873_v9 }
 0x29a   : > { %v2338_v35 = vadd.f32 %v3888_v42, %v2302_v31 }
 0x29c   : > { %v2370_v37 = vmax.f32 %v2338_v35, 0.0  ;;  %v2254_v13 = vpop.f32.mrf.mxu0 }
 0x29d   : > { %v2114_v17 = vpop.f32.mrf.mxu3  ;;  %v1829_v44 = vpop.f32.mrf.mxu1 }
 0x29e   : > { %v2402_v36 = vmin.f32 %v2370_v37, 6.0  ;;  %v2163_v55 = vadd.f32 %v2114_v17, %v2007_v23  ;;  %v1875_v48 = vadd.f32 %v1829_v44, %v3825_v0 }
 0x2a0   : > { %2434 = vst.msk [vmem:[%s3900_s20 + $0xa0] sm:$0xff] %vm739_vm4, %v2402_v36  ;;  %v2303_v49 = vadd.f32 %v2254_v13, %v2163_v55  ;;  %v1961_v21 = vpop.f32.mrf.mxu2 }
 0x2a1   : > { %v2008_v61 = vadd.f32 %v1961_v21, %v1874_v16 }
 0x2a2   : > { %v2339_v28 = vadd.f32 %v3888_v42, %v2303_v49 }
 0x2a4   : > { %v2371_v15 = vmax.f32 %v2339_v28, 0.0  ;;  %v2257_v33 = vpop.f32.mrf.mxu0 }
 0x2a5   : > { %v2117_v46 = vpop.f32.mrf.mxu3  ;;  %v1832_v11 = vpop.f32.mrf.mxu1 }
 0x2a6   : > { %v2403_v3 = vmin.f32 %v2371_v15, 6.0  ;;  %v2164_v40 = vadd.f32 %v2117_v46, %v2008_v61  ;;  %v1876_v54 = vadd.f32 %v1832_v11, %v3834_v29 }
 0x2a8   : > { %2435 = vst.msk [vmem:[%s3900_s20 + $0xa8] sm:$0xff] %vm739_vm4, %v2403_v3  ;;  %v2304_v19 = vadd.f32 %v2257_v33, %v2164_v40  ;;  %v1963_v26 = vpop.f32.mrf.mxu2 }
 0x2a9   : > { %v2009_v56 = vadd.f32 %v1963_v26, %v1875_v48 }
 0x2aa   : > { %v2340_v50 = vadd.f32 %v3888_v42, %v2304_v19 }
 0x2ac   : > { %v2372_v6 = vmax.f32 %v2340_v50, 0.0  ;;  %v2259_v39 = vpop.f32.mrf.mxu0 }
 0x2ad   : > { %v2119_v14 = vpop.f32.mrf.mxu3  ;;  %v1834_v18 = vpop.f32.mrf.mxu1 }
 0x2ae   : > { %v2404_v30 = vmin.f32 %v2372_v6, 6.0  ;;  %v2165_v34 = vadd.f32 %v2119_v14, %v2009_v56  ;;  %v1877_v27 = vadd.f32 %v1834_v18, %v3839_v52 }
 0x2b0   : > { %2436 = vst.msk [vmem:[%s3900_s20 + $0xb0] sm:$0xff] %vm739_vm4, %v2404_v30  ;;  %v2305_v45 = vadd.f32 %v2259_v39, %v2165_v34  ;;  %v1966_v10 = vpop.f32.mrf.mxu2 }
 0x2b1   : > { %v2010_v0 = vadd.f32 %v1966_v10, %v1876_v54 }
 0x2b2   : > { %v2341_v59 = vadd.f32 %v3888_v42, %v2305_v45 }
 0x2b4   : > { %v2373_v24 = vmax.f32 %v2341_v59, 0.0  ;;  %v2262_v1 = vpop.f32.mrf.mxu0 }
 0x2b5   : > { %v2122_v58 = vpop.f32.mrf.mxu3  ;;  %v1837_v53 = vpop.f32.mrf.mxu1 }
 0x2b6   : > { %v2405_v12 = vmin.f32 %v2373_v24, 6.0  ;;  %v2166_v57 = vadd.f32 %v2122_v58, %v2010_v0  ;;  %v1878_v31 = vadd.f32 %v1837_v53, %v3848_v20 }
 0x2b8   : > { %2437 = vst.msk [vmem:[%s3900_s20 + $0xb8] sm:$0xff] %vm739_vm4, %v2405_v12  ;;  %v2306_v32 = vadd.f32 %v2262_v1, %v2166_v57  ;;  %v1968_v38 = vpop.f32.mrf.mxu2 }
 0x2b9   : > { %v2011_v29 = vadd.f32 %v1968_v38, %v1877_v27 }
 0x2ba   : > { %v2342_v7 = vadd.f32 %v3888_v42, %v2306_v32 }
 0x2bc   : > { %v2374_v47 = vmax.f32 %v2342_v7, 0.0  ;;  %v2264_v62 = vpop.f32.mrf.mxu0 }
 0x2bd   : > { %v2124_v22 = vpop.f32.mrf.mxu3  ;;  %v1839_v25 = vpop.f32.mrf.mxu1 }
 0x2be   : > { %v2406_v60 = vmin.f32 %v2374_v47, 6.0  ;;  %v2167_v41 = vadd.f32 %v2124_v22, %v2011_v29  ;;  %v1879_v55 = vadd.f32 %v1839_v25, %v3853_v8 }
 0x2c0   : > { %2438 = vst.msk [vmem:[%s3900_s20 + $0xc0] sm:$0xff] %vm739_vm4, %v2406_v60  ;;  %v2307_v4 = vadd.f32 %v2264_v62, %v2167_v41  ;;  %v1971_v9 = vpop.f32.mrf.mxu2 }
 0x2c1   : > { %v2012_v52 = vadd.f32 %v1971_v9, %v1878_v31 }
 0x2c2   : > { %v2343_v43 = vadd.f32 %v3888_v42, %v2307_v4 }
 0x2c4   : > { %v2375_v35 = vmax.f32 %v2343_v43, 0.0  ;;  %v2267_v23 = vpop.f32.mrf.mxu0 }
 0x2c5   : > { %v2127_v37 = vpop.f32.mrf.mxu3  ;;  %v1842_v44 = vpop.f32.mrf.mxu1 }
 0x2c6   : > { %v2407_v13 = vmin.f32 %v2375_v35, 6.0  ;;  %v2168_v17 = vadd.f32 %v2127_v37, %v2012_v52  ;;  %v1880_v11 = vadd.f32 %v1842_v44, %v3862_v51 }
 0x2c8   : > { %2439 = vst.msk [vmem:[%s3900_s20 + $0xc8] sm:$0xff] %vm739_vm4, %v2407_v13  ;;  %v2308_v36 = vadd.f32 %v2267_v23, %v2168_v17  ;;  %v1973_v49 = vpop.f32.mrf.mxu2 }
 0x2c9   : > { %v2013_v20 = vadd.f32 %v1973_v49, %v1879_v55 }
 0x2ca   : > { %v2344_v16 = vadd.f32 %v3888_v42, %v2308_v36 }
 0x2cc   : > { %v2376_v21 = vmax.f32 %v2344_v16, 0.0  ;;  %v2269_v28 = vpop.f32.mrf.mxu0 }
 0x2cd   : > { %v2129_v61 = vpop.f32.mrf.mxu3  ;;  %v1844_v40 = vpop.f32.mrf.mxu1 }
 0x2ce   : > { %v2408_v15 = vmin.f32 %v2376_v21, 6.0  ;;  %v2169_v33 = vadd.f32 %v2129_v61, %v2013_v20  ;;  %v1881_v14 = vadd.f32 %v1844_v40, %v3867_v63 }
 0x2d0   : > { %2440 = vst.msk [vmem:[%s3900_s20 + $0xd0] sm:$0xff] %vm739_vm4, %v2408_v15  ;;  %v2309_v46 = vadd.f32 %v2269_v28, %v2169_v33  ;;  %v1976_v3 = vpop.f32.mrf.mxu2 }
 0x2d1   : > { %v2014_v8 = vadd.f32 %v1976_v3, %v1880_v11 }
 0x2d2   : > { %v2345_v19 = vadd.f32 %v3888_v42, %v2309_v46 }
 0x2d4   : > { %v2377_v48 = vmax.f32 %v2345_v19, 0.0  ;;  %v2272_v26 = vpop.f32.mrf.mxu0 }
 0x2d5   : > { %v2132_v50 = vpop.f32.mrf.mxu3  ;;  %v1847_v34 = vpop.f32.mrf.mxu1 }
 0x2d6   : > { %v2409_v56 = vmin.f32 %v2377_v48, 6.0  ;;  %v2170_v6 = vadd.f32 %v2132_v50, %v2014_v8  ;;  %v1882_v1 = vadd.f32 %v1847_v34, %v3876_v2 }
 0x2d8   : > { %2441 = vst.msk [vmem:[%s3900_s20 + $0xd8] sm:$0xff] %vm739_vm4, %v2409_v56  ;;  %v2310_v39 = vadd.f32 %v2272_v26, %v2170_v6  ;;  %v1978_v18 = vpop.f32.mrf.mxu2 }
 0x2d9   : > { %v2015_v51 = vadd.f32 %v1978_v18, %v1881_v14 }
 0x2da   : > { %v2346_v30 = vadd.f32 %v3888_v42, %v2310_v39 }
 0x2dc   : > { %v2378_v45 = vmax.f32 %v2346_v30, 0.0  ;;  %v2274_v54 = vpop.f32.mrf.mxu0 }
 0x2dd   : > { %v2134_v10 = vpop.f32.mrf.mxu3  ;;  %v1849_v57 = vpop.f32.mrf.mxu1 }
 0x2de   : > { %v2410_v59 = vmin.f32 %v2378_v45, 6.0  ;;  %v2171_v0 = vadd.f32 %v2134_v10, %v2015_v51  ;;  %v1883_v47 = vadd.f32 %v1849_v57, %v3881_v5 }
 0x2e0   : > { %2442 = vst.msk [vmem:[%s3900_s20 + $0xe0] sm:$0xff] %vm739_vm4, %v2410_v59  ;;  %v2311_v24 = vadd.f32 %v2274_v54, %v2171_v0  ;;  %v1981_v58 = vpop.f32.mrf.mxu2 }
 0x2e1   : > { %v2016_v63 = vadd.f32 %v1981_v58, %v1882_v1 }
 0x2e2   : > { %v2347_v53 = vadd.f32 %v3888_v42, %v2311_v24 }
 0x2e4   : > { %v2379_v12 = vmax.f32 %v2347_v53, 0.0  ;;  %v2277_v32 = vpop.f32.mrf.mxu0 }
 0x2e5   : > { %v2137_v27 = vpop.f32.mrf.mxu3 }
 0x2e6   : > { %v2411_v38 = vmin.f32 %v2379_v12, 6.0  ;;  %v2172_v7 = vadd.f32 %v2137_v27, %v2016_v63 }
 0x2e8   : > { %2443 = vst.msk [vmem:[%s3900_s20 + $0xe8] sm:$0xff] %vm739_vm4, %v2411_v38  ;;  %v2312_v29 = vadd.f32 %v2277_v32, %v2172_v7  ;;  %v1983_v62 = vpop.f32.mrf.mxu2 }
 0x2e9   : > { %v2017_v22 = vadd.f32 %v1983_v62, %v1883_v47 }
 0x2ea   : > { %v2348_v2 = vadd.f32 %v3888_v42, %v2312_v29 }
 0x2ec   : > { %v2380_v25 = vmax.f32 %v2348_v2, 0.0  ;;  %v2279_v31 = vpop.f32.mrf.mxu0 }
 0x2ed   : > { %v2139_v60 = vpop.f32.mrf.mxu3 }
 0x2ee   : > { %v2412_v41 = vmin.f32 %v2380_v25, 6.0  ;;  %v2173_v4 = vadd.f32 %v2139_v60, %v2017_v22 }
 0x2f0   : > { %2444 = vst.msk [vmem:[%s3900_s20 + $0xf0] sm:$0xff] %vm739_vm4, %v2412_v41  ;;  %v2313_v9 = vadd.f32 %v2279_v31, %v2173_v4 }
 0x2f2   : > { %v2349_v43 = vadd.f32 %v3888_v42, %v2313_v9 }
 0x2f4   : > { %v2381_v52 = vmax.f32 %v2349_v43, 0.0 }
 0x2f6   : > { %v2413_v35 = vmin.f32 %v2381_v52, 6.0 }
 0x2f8   : > { %2445 = vst.msk [vmem:[%s3900_s20 + $0xf8] sm:$0xff] %vm739_vm4, %v2413_v35 }
 0x2f9 PF: > { %s13_s14 = sadd.s32 1, %s2907_s14   ;;  %s4256_s12 = smov %s2903_s13 }
 0x2fa   : > { %p10_p5 = scmp.ge.s32.totalorder %s13_s14, 4   ;;  %s4257_s13 = smov %s4259_s15 }
 0x2fc   :  { %12 = sbr.rel (!%p10_p5) target bundleno = 2 (0x2), region = 77 }

</bundles_post_ra>
